<compile_context>
chip_gen: v6e
topology: v6e:2x2x1
jax: 0.10.0
libtpu: 0.0.40
codegen_flags: <defaults>
</compile_context>

<pallas_src>
import functools

import jax
import jax.numpy as jnp
from jax import lax
from jax.experimental import pallas as pl
from jax.experimental.pallas import tpu as pltpu


def _dws_conv_kernel(x_ref, wdw_ref, bn1s_ref, bn1b_ref, wpw_ref,
                     bn2s_ref, bn2b_ref, o_ref, *,
                     H, W, C, Cout, has_residual, has_pw_act):
    """Fused depthwise-separable conv block for one NHWC image.

    x_ref   : (1, H+2, W+2, C)  spatially zero-padded input tile
    wdw_ref : (3, 3, C)         depthwise 3x3 weights (per channel)
    bn1*_ref: (1, C)            folded BN1 scale / bias
    wpw_ref : (C, Cout)         pointwise 1x1 weights
    bn2*_ref: (1, Cout)         folded BN2 scale / bias
    o_ref   : (1, H, W, Cout)
    """
    x = x_ref[0].astype(jnp.float32)             # (H+2, W+2, C)
    w_dw = wdw_ref[...].astype(jnp.float32)      # (3, 3, C)

    # Depthwise 3x3 (stride 1): nine shifted taps, per-channel MAC on the VPU.
    acc = jnp.zeros((H, W, C), jnp.float32)
    for dy in range(3):
        for dx in range(3):
            tap = x[dy:dy + H, dx:dx + W, :]               # (H, W, C)
            tap_w = w_dw[dy:dy + 1, dx:dx + 1, :]          # (1, 1, C)
            acc = acc + tap * tap_w

    # Folded BN1 + ReLU.
    acc = acc * bn1s_ref[...].reshape(1, 1, C) + bn1b_ref[...].reshape(1, 1, C)
    acc = jnp.maximum(acc, 0.0)

    # Pointwise 1x1 conv == matmul on the MXU.
    y2 = acc.reshape(H * W, C)
    z = jnp.dot(y2, wpw_ref[...].astype(jnp.float32),
                preferred_element_type=jnp.float32)        # (H*W, Cout)

    # Folded BN2 (+ optional pointwise activation).
    z = z * bn2s_ref[...] + bn2b_ref[...]
    if has_pw_act:
        z = jnp.maximum(z, 0.0)

    # Residual (only when stride==1 and C == Cout; decided at trace time).
    if has_residual:
        z = z + x[1:1 + H, 1:1 + W, :].reshape(H * W, C)

    o_ref[...] = z.reshape(1, H, W, Cout).astype(o_ref.dtype)


def depthwise_separable_conv_pallas(x_nchw, w_dw, w_pw,
                                    bn1_scale, bn1_bias, bn2_scale, bn2_bias,
                                    *, has_residual, has_pw_act=False):
    """x_nchw: (B, C, H, W). w_dw: (3, 3, C). w_pw: (C, Cout).
    bn*_scale / bn*_bias: BatchNorm folded to per-channel affine (inference)."""
    B, C, H, W = x_nchw.shape
    Cout = w_pw.shape[1]
    Hp, Wp = H + 2, W + 2

    # NHWC: channels on lanes (lane-dense for the VPU taps, the MXU matmul and
    # the output stores). The spatial zero-pad is the genuine 3x3 'same' halo
    # needed by the conv; XLA fuses it with the transpose copy.
    x = jnp.transpose(x_nchw, (0, 2, 3, 1))
    x = jnp.pad(x, ((0, 0), (1, 1), (1, 1), (0, 0)))

    f32 = jnp.float32
    bn1_scale = bn1_scale.reshape(1, C).astype(f32)
    bn1_bias = bn1_bias.reshape(1, C).astype(f32)
    bn2_scale = bn2_scale.reshape(1, Cout).astype(f32)
    bn2_bias = bn2_bias.reshape(1, Cout).astype(f32)
    w_dw = w_dw.astype(f32)
    w_pw = w_pw.astype(f32)

    kernel = functools.partial(
        _dws_conv_kernel, H=H, W=W, C=C, Cout=Cout,
        has_residual=has_residual, has_pw_act=has_pw_act)

    # Explicit VMEM budget: double-buffered input/output tiles + weights +
    # f32 intermediates, with headroom; capped below v7x's 64 MiB physical VMEM.
    in_bytes = Hp * Wp * C * x.dtype.itemsize
    out_bytes = H * W * Cout * x_nchw.dtype.itemsize
    acc_bytes = H * W * max(C, Cout) * 4
    vmem_limit = int(min(max(4 * (in_bytes + out_bytes) + 4 * acc_bytes
                             + (8 << 20), 32 << 20), 48 << 20))

    out = pl.pallas_call(
        kernel,
        out_shape=jax.ShapeDtypeStruct((B, H, W, Cout), x_nchw.dtype),
        grid_spec=pltpu.PrefetchScalarGridSpec(
            num_scalar_prefetch=0,
            grid=(B,),   # one full image per step; parallel across TCs on v7x
            in_specs=[
                pl.BlockSpec((1, Hp, Wp, C), lambda b: (b, 0, 0, 0)),
                pl.BlockSpec((3, 3, C), lambda b: (0, 0, 0)),
                pl.BlockSpec((1, C), lambda b: (0, 0)),
                pl.BlockSpec((1, C), lambda b: (0, 0)),
                pl.BlockSpec((C, Cout), lambda b: (0, 0)),
                pl.BlockSpec((1, Cout), lambda b: (0, 0)),
                pl.BlockSpec((1, Cout), lambda b: (0, 0)),
            ],
            out_specs=pl.BlockSpec((1, H, W, Cout), lambda b: (b, 0, 0, 0)),
        ),
        compiler_params=pltpu.CompilerParams(
            dimension_semantics=("parallel",),
            vmem_limit_bytes=vmem_limit,
        ),
    )(x, w_dw, bn1_scale, bn1_bias, w_pw, bn2_scale, bn2_bias)

    # TODO(synk): for very large H*W add halo-tiled spatial blocking so the
    # per-image tile stays within v7x's 64 MiB VMEM.
    return jnp.transpose(out, (0, 3, 1, 2))


def _fold_bn(gamma, beta, mean, var, eps):
    scale = gamma / jnp.sqrt(var + eps)
    bias = beta - mean * scale
    return scale, bias


class DepthwiseSeparableConv:
    """JAX/Pallas equivalent of the PyTorch DepthwiseSeparableConv block
    (inference / eval mode, default config of the reference module)."""

    def __init__(self, w_dw, w_pw,
                 bn1_gamma, bn1_beta, bn1_mean, bn1_var,
                 bn2_gamma, bn2_beta, bn2_mean, bn2_var,
                 *, stride=1, noskip=False, pw_act=False, se_ratio=0.0,
                 drop_connect_rate=0.0, bn_eps=1e-5):
        if stride != 1:
            # TODO(synk): stride=2 depthwise conv not implemented (module default is 1).
            raise NotImplementedError("stride=2 not implemented")
        if se_ratio is not None and se_ratio > 0.0:
            # TODO(synk): SqueezeExcite branch not implemented (module default se_ratio=0.0).
            raise NotImplementedError("SqueezeExcite not implemented")
        # drop_connect is a no-op in eval mode (training=False), so it is skipped.
        self.w_dw = w_dw                      # (3, 3, C)
        self.w_pw = w_pw                      # (C, Cout)
        self.bn1_scale, self.bn1_bias = _fold_bn(bn1_gamma, bn1_beta,
                                                 bn1_mean, bn1_var, bn_eps)
        self.bn2_scale, self.bn2_bias = _fold_bn(bn2_gamma, bn2_beta,
                                                 bn2_mean, bn2_var, bn_eps)
        in_chs = w_dw.shape[-1]
        out_chs = w_pw.shape[-1]
        self.has_residual = (stride == 1 and in_chs == out_chs and not noskip)
        self.has_pw_act = pw_act

    def __call__(self, x_nchw):
        return depthwise_separable_conv_pallas(
            x_nchw, self.w_dw, self.w_pw,
            self.bn1_scale, self.bn1_bias, self.bn2_scale, self.bn2_bias,
            has_residual=self.has_residual, has_pw_act=self.has_pw_act)


def _ref_forward(x_nchw, w_dw, w_pw, bn1_s, bn1_b, bn2_s, bn2_b,
                 has_residual, has_pw_act):
    """Pure-JAX reference (same math, XLA convs)."""
    B, C, H, W = x_nchw.shape
    Cout = w_pw.shape[1]
    x = jnp.transpose(x_nchw, (0, 2, 3, 1)).astype(jnp.float32)
    rhs = w_dw.astype(jnp.float32).reshape(3, 3, 1, C)
    y = lax.conv_general_dilated(
        x, rhs, window_strides=(1, 1), padding="SAME",
        dimension_numbers=("NHWC", "HWIO", "NHWC"),
        feature_group_count=C)
    y = y * bn1_s.reshape(1, 1, 1, C) + bn1_b.reshape(1, 1, 1, C)
    y = jnp.maximum(y, 0.0)
    z = jnp.einsum("bhwc,cd->bhwd", y, w_pw.astype(jnp.float32))
    z = z * bn2_s.reshape(1, 1, 1, Cout) + bn2_b.reshape(1, 1, 1, Cout)
    if has_pw_act:
        z = jnp.maximum(z, 0.0)
    if has_residual:
        z = z + x
    return jnp.transpose(z, (0, 3, 1, 2))


if __name__ == "__main__":
    key = jax.random.PRNGKey(0)
    B, C, H, W = 2, 32, 16, 16       # in_chs == out_chs -> residual path active
    Cout = 32
    ks = jax.random.split(key, 11)

    x = jax.random.normal(ks[0], (B, C, H, W), dtype=jnp.float32)
    w_dw = 0.1 * jax.random.normal(ks[1], (3, 3, C), dtype=jnp.float32)
    w_pw = 0.1 * jax.random.normal(ks[2], (C, Cout), dtype=jnp.float32)
    bn1_gamma = 1.0 + 0.1 * jax.random.normal(ks[3], (C,), dtype=jnp.float32)
    bn1_beta = 0.1 * jax.random.normal(ks[4], (C,), dtype=jnp.float32)
    bn1_mean = 0.1 * jax.random.normal(ks[5], (C,), dtype=jnp.float32)
    bn1_var = jax.random.uniform(ks[6], (C,), dtype=jnp.float32,
                                 minval=0.5, maxval=1.5)
    bn2_gamma = 1.0 + 0.1 * jax.random.normal(ks[7], (Cout,), dtype=jnp.float32)
    bn2_beta = 0.1 * jax.random.normal(ks[8], (Cout,), dtype=jnp.float32)
    bn2_mean = 0.1 * jax.random.normal(ks[9], (Cout,), dtype=jnp.float32)
    bn2_var = jax.random.uniform(ks[10], (Cout,), dtype=jnp.float32,
                                 minval=0.5, maxval=1.5)

    mod = DepthwiseSeparableConv(
        w_dw, w_pw,
        bn1_gamma, bn1_beta, bn1_mean, bn1_var,
        bn2_gamma, bn2_beta, bn2_mean, bn2_var)

    y = mod(x)
    y = jax.block_until_ready(y)

    ref = _ref_forward(x, w_dw, w_pw,
                       mod.bn1_scale, mod.bn1_bias,
                       mod.bn2_scale, mod.bn2_bias,
                       mod.has_residual, mod.has_pw_act)

    assert y.shape == (B, Cout, H, W), y.shape
    max_err = float(jnp.max(jnp.abs(y - ref)))
    assert jnp.allclose(y, ref, atol=1e-3, rtol=1e-3), f"mismatch: {max_err}"

    print("KERNEL_OK")
</pallas_src>

<mosaic_0001>
module attributes {stable_mosaic.version = 11 : i64} {
  func.func @_dws_conv_kernel(%arg0: i32, %arg1: memref<1x18x18x32xf32, #tpu.memory_space<vmem>>, %arg2: memref<3x3x32xf32, #tpu.memory_space<vmem>>, %arg3: memref<1x32xf32, #tpu.memory_space<vmem>>, %arg4: memref<1x32xf32, #tpu.memory_space<vmem>>, %arg5: memref<32x32xf32, #tpu.memory_space<vmem>>, %arg6: memref<1x32xf32, #tpu.memory_space<vmem>>, %arg7: memref<1x32xf32, #tpu.memory_space<vmem>>, %arg8: memref<1x16x16x32xf32, #tpu.memory_space<vmem>>) attributes {dimension_semantics = [#tpu.dimension_semantics<parallel>], iteration_bounds = array<i64: 2>, scalar_prefetch = 0 : i64, scratch_operands = 0 : i64, tpu.core_type = #tpu.core_type<tc>, window_params = [{transform_indices = @transform_0, window_bounds = array<i64: 1, 18, 18, 32>}, {pipeline_mode = #tpu.pipeline_mode<synchronous>, transform_indices = @transform_1, window_bounds = array<i64: 3, 3, 32>}, {pipeline_mode = #tpu.pipeline_mode<synchronous>, transform_indices = @transform_2, window_bounds = array<i64: 1, 32>}, {pipeline_mode = #tpu.pipeline_mode<synchronous>, transform_indices = @transform_3, window_bounds = array<i64: 1, 32>}, {pipeline_mode = #tpu.pipeline_mode<synchronous>, transform_indices = @transform_4, window_bounds = array<i64: 32, 32>}, {pipeline_mode = #tpu.pipeline_mode<synchronous>, transform_indices = @transform_5, window_bounds = array<i64: 1, 32>}, {pipeline_mode = #tpu.pipeline_mode<synchronous>, transform_indices = @transform_6, window_bounds = array<i64: 1, 32>}, {transform_indices = @transform_7, window_bounds = array<i64: 1, 16, 16, 32>}]} {
    %c0 = arith.constant 0 : index
    %c0_0 = arith.constant 0 : index
    %c0_1 = arith.constant 0 : index
    %c0_2 = arith.constant 0 : index
    %0 = vector.load %arg1[%c0, %c0_0, %c0_1, %c0_2] : memref<1x18x18x32xf32, #tpu.memory_space<vmem>>, vector<1x18x18x32xf32>
    %1 = vector.shape_cast %0 : vector<1x18x18x32xf32> to vector<18x18x32xf32>
    %c0_3 = arith.constant 0 : index
    %c0_4 = arith.constant 0 : index
    %c0_5 = arith.constant 0 : index
    %2 = vector.load %arg2[%c0_3, %c0_4, %c0_5] : memref<3x3x32xf32, #tpu.memory_space<vmem>>, vector<3x3x32xf32>
    %cst = arith.constant 0.000000e+00 : f32
    %3 = vector.broadcast %cst : f32 to vector<16x16x32xf32>
    %4 = vector.extract_strided_slice %1 {offsets = [0, 0, 0], sizes = [16, 16, 32], strides = [1, 1, 1]} : vector<18x18x32xf32> to vector<16x16x32xf32>
    %5 = vector.extract_strided_slice %2 {offsets = [0, 0, 0], sizes = [1, 1, 32], strides = [1, 1, 1]} : vector<3x3x32xf32> to vector<1x1x32xf32>
    %6 = vector.broadcast %5 : vector<1x1x32xf32> to vector<16x16x32xf32>
    %7 = arith.mulf %4, %6 : vector<16x16x32xf32>
    %8 = arith.addf %3, %7 : vector<16x16x32xf32>
    %9 = vector.extract_strided_slice %1 {offsets = [0, 1, 0], sizes = [16, 16, 32], strides = [1, 1, 1]} : vector<18x18x32xf32> to vector<16x16x32xf32>
    %10 = vector.extract_strided_slice %2 {offsets = [0, 1, 0], sizes = [1, 1, 32], strides = [1, 1, 1]} : vector<3x3x32xf32> to vector<1x1x32xf32>
    %11 = vector.broadcast %10 : vector<1x1x32xf32> to vector<16x16x32xf32>
    %12 = arith.mulf %9, %11 : vector<16x16x32xf32>
    %13 = arith.addf %8, %12 : vector<16x16x32xf32>
    %14 = vector.extract_strided_slice %1 {offsets = [0, 2, 0], sizes = [16, 16, 32], strides = [1, 1, 1]} : vector<18x18x32xf32> to vector<16x16x32xf32>
    %15 = vector.extract_strided_slice %2 {offsets = [0, 2, 0], sizes = [1, 1, 32], strides = [1, 1, 1]} : vector<3x3x32xf32> to vector<1x1x32xf32>
    %16 = vector.broadcast %15 : vector<1x1x32xf32> to vector<16x16x32xf32>
    %17 = arith.mulf %14, %16 : vector<16x16x32xf32>
    %18 = arith.addf %13, %17 : vector<16x16x32xf32>
    %19 = vector.extract_strided_slice %1 {offsets = [1, 0, 0], sizes = [16, 16, 32], strides = [1, 1, 1]} : vector<18x18x32xf32> to vector<16x16x32xf32>
    %20 = vector.extract_strided_slice %2 {offsets = [1, 0, 0], sizes = [1, 1, 32], strides = [1, 1, 1]} : vector<3x3x32xf32> to vector<1x1x32xf32>
    %21 = vector.broadcast %20 : vector<1x1x32xf32> to vector<16x16x32xf32>
    %22 = arith.mulf %19, %21 : vector<16x16x32xf32>
    %23 = arith.addf %18, %22 : vector<16x16x32xf32>
    %24 = vector.extract_strided_slice %1 {offsets = [1, 1, 0], sizes = [16, 16, 32], strides = [1, 1, 1]} : vector<18x18x32xf32> to vector<16x16x32xf32>
    %25 = vector.extract_strided_slice %2 {offsets = [1, 1, 0], sizes = [1, 1, 32], strides = [1, 1, 1]} : vector<3x3x32xf32> to vector<1x1x32xf32>
    %26 = vector.broadcast %25 : vector<1x1x32xf32> to vector<16x16x32xf32>
    %27 = arith.mulf %24, %26 : vector<16x16x32xf32>
    %28 = arith.addf %23, %27 : vector<16x16x32xf32>
    %29 = vector.extract_strided_slice %1 {offsets = [1, 2, 0], sizes = [16, 16, 32], strides = [1, 1, 1]} : vector<18x18x32xf32> to vector<16x16x32xf32>
    %30 = vector.extract_strided_slice %2 {offsets = [1, 2, 0], sizes = [1, 1, 32], strides = [1, 1, 1]} : vector<3x3x32xf32> to vector<1x1x32xf32>
    %31 = vector.broadcast %30 : vector<1x1x32xf32> to vector<16x16x32xf32>
    %32 = arith.mulf %29, %31 : vector<16x16x32xf32>
    %33 = arith.addf %28, %32 : vector<16x16x32xf32>
    %34 = vector.extract_strided_slice %1 {offsets = [2, 0, 0], sizes = [16, 16, 32], strides = [1, 1, 1]} : vector<18x18x32xf32> to vector<16x16x32xf32>
    %35 = vector.extract_strided_slice %2 {offsets = [2, 0, 0], sizes = [1, 1, 32], strides = [1, 1, 1]} : vector<3x3x32xf32> to vector<1x1x32xf32>
    %36 = vector.broadcast %35 : vector<1x1x32xf32> to vector<16x16x32xf32>
    %37 = arith.mulf %34, %36 : vector<16x16x32xf32>
    %38 = arith.addf %33, %37 : vector<16x16x32xf32>
    %39 = vector.extract_strided_slice %1 {offsets = [2, 1, 0], sizes = [16, 16, 32], strides = [1, 1, 1]} : vector<18x18x32xf32> to vector<16x16x32xf32>
    %40 = vector.extract_strided_slice %2 {offsets = [2, 1, 0], sizes = [1, 1, 32], strides = [1, 1, 1]} : vector<3x3x32xf32> to vector<1x1x32xf32>
    %41 = vector.broadcast %40 : vector<1x1x32xf32> to vector<16x16x32xf32>
    %42 = arith.mulf %39, %41 : vector<16x16x32xf32>
    %43 = arith.addf %38, %42 : vector<16x16x32xf32>
    %44 = vector.extract_strided_slice %1 {offsets = [2, 2, 0], sizes = [16, 16, 32], strides = [1, 1, 1]} : vector<18x18x32xf32> to vector<16x16x32xf32>
    %45 = vector.extract_strided_slice %2 {offsets = [2, 2, 0], sizes = [1, 1, 32], strides = [1, 1, 1]} : vector<3x3x32xf32> to vector<1x1x32xf32>
    %46 = vector.broadcast %45 : vector<1x1x32xf32> to vector<16x16x32xf32>
    %47 = arith.mulf %44, %46 : vector<16x16x32xf32>
    %48 = arith.addf %43, %47 : vector<16x16x32xf32>
    %c0_6 = arith.constant 0 : index
    %c0_7 = arith.constant 0 : index
    %49 = vector.load %arg3[%c0_6, %c0_7] : memref<1x32xf32, #tpu.memory_space<vmem>>, vector<1x32xf32>
    %50 = vector.shape_cast %49 : vector<1x32xf32> to vector<1x1x32xf32>
    %51 = vector.broadcast %50 : vector<1x1x32xf32> to vector<16x16x32xf32>
    %52 = arith.mulf %48, %51 : vector<16x16x32xf32>
    %c0_8 = arith.constant 0 : index
    %c0_9 = arith.constant 0 : index
    %53 = vector.load %arg4[%c0_8, %c0_9] : memref<1x32xf32, #tpu.memory_space<vmem>>, vector<1x32xf32>
    %54 = vector.shape_cast %53 : vector<1x32xf32> to vector<1x1x32xf32>
    %55 = vector.broadcast %54 : vector<1x1x32xf32> to vector<16x16x32xf32>
    %56 = arith.addf %52, %55 : vector<16x16x32xf32>
    %cst_10 = arith.constant 0.000000e+00 : f32
    %57 = vector.broadcast %cst_10 : f32 to vector<16x16x32xf32>
    %58 = arith.maximumf %56, %57 : vector<16x16x32xf32>
    %59 = vector.shape_cast %58 : vector<16x16x32xf32> to vector<256x32xf32>
    %c0_11 = arith.constant 0 : index
    %c0_12 = arith.constant 0 : index
    %60 = vector.load %arg5[%c0_11, %c0_12] : memref<32x32xf32, #tpu.memory_space<vmem>>, vector<32x32xf32>
    %cst_13 = arith.constant dense<0.000000e+00> : vector<256x32xf32>
    %61 = tpu.matmul %59, %60, %cst_13 {dimension_numbers = #tpu.dot_dimension_numbers<[1], [0], [0], [1], [0, 0, 1, 1], [], []>} : vector<256x32xf32>, vector<32x32xf32>, vector<256x32xf32> -> vector<256x32xf32>
    %c0_14 = arith.constant 0 : index
    %c0_15 = arith.constant 0 : index
    %62 = vector.load %arg6[%c0_14, %c0_15] : memref<1x32xf32, #tpu.memory_space<vmem>>, vector<1x32xf32>
    %63 = vector.broadcast %62 : vector<1x32xf32> to vector<256x32xf32>
    %64 = arith.mulf %61, %63 : vector<256x32xf32>
    %c0_16 = arith.constant 0 : index
    %c0_17 = arith.constant 0 : index
    %65 = vector.load %arg7[%c0_16, %c0_17] : memref<1x32xf32, #tpu.memory_space<vmem>>, vector<1x32xf32>
    %66 = vector.broadcast %65 : vector<1x32xf32> to vector<256x32xf32>
    %67 = arith.addf %64, %66 : vector<256x32xf32>
    %68 = vector.extract_strided_slice %1 {offsets = [1, 1, 0], sizes = [16, 16, 32], strides = [1, 1, 1]} : vector<18x18x32xf32> to vector<16x16x32xf32>
    %69 = vector.shape_cast %68 : vector<16x16x32xf32> to vector<256x32xf32>
    %70 = arith.addf %67, %69 : vector<256x32xf32>
    %71 = vector.shape_cast %70 : vector<256x32xf32> to vector<1x16x16x32xf32>
    %c0_18 = arith.constant 0 : index
    %c0_19 = arith.constant 0 : index
    %c0_20 = arith.constant 0 : index
    %c0_21 = arith.constant 0 : index
    %72 = vector.load %arg8[%c0_18, %c0_19, %c0_20, %c0_21] : memref<1x16x16x32xf32, #tpu.memory_space<vmem>>, vector<1x16x16x32xf32>
    tpu.vector_store %arg8[%c0_18, %c0_19, %c0_20, %c0_21], %71 {strides = array<i32>} : memref<1x16x16x32xf32, #tpu.memory_space<vmem>>, vector<1x16x16x32xf32>,
    return
  }
  func.func @transform_0(%arg0: i32) -> (i32, i32, i32, i32) {
    %c0_i32 = arith.constant 0 : i32
    %c0_i32_0 = arith.constant 0 : i32
    %c0_i32_1 = arith.constant 0 : i32
    %c0_i32_2 = arith.constant 0 : i32
    return %arg0, %c0_i32, %c0_i32_0, %c0_i32_1 : i32, i32, i32, i32
  }
  func.func @transform_1(%arg0: i32) -> (i32, i32, i32) {
    %c0_i32 = arith.constant 0 : i32
    %c0_i32_0 = arith.constant 0 : i32
    %c0_i32_1 = arith.constant 0 : i32
    %c0_i32_2 = arith.constant 0 : i32
    return %c0_i32, %c0_i32_0, %c0_i32_1 : i32, i32, i32
  }
  func.func @transform_2(%arg0: i32) -> (i32, i32) {
    %c0_i32 = arith.constant 0 : i32
    %c0_i32_0 = arith.constant 0 : i32
    %c0_i32_1 = arith.constant 0 : i32
    return %c0_i32, %c0_i32_0 : i32, i32
  }
  func.func @transform_3(%arg0: i32) -> (i32, i32) {
    %c0_i32 = arith.constant 0 : i32
    %c0_i32_0 = arith.constant 0 : i32
    %c0_i32_1 = arith.constant 0 : i32
    return %c0_i32, %c0_i32_0 : i32, i32
  }
  func.func @transform_4(%arg0: i32) -> (i32, i32) {
    %c0_i32 = arith.constant 0 : i32
    %c0_i32_0 = arith.constant 0 : i32
    %c0_i32_1 = arith.constant 0 : i32
    return %c0_i32, %c0_i32_0 : i32, i32
  }
  func.func @transform_5(%arg0: i32) -> (i32, i32) {
    %c0_i32 = arith.constant 0 : i32
    %c0_i32_0 = arith.constant 0 : i32
    %c0_i32_1 = arith.constant 0 : i32
    return %c0_i32, %c0_i32_0 : i32, i32
  }
  func.func @transform_6(%arg0: i32) -> (i32, i32) {
    %c0_i32 = arith.constant 0 : i32
    %c0_i32_0 = arith.constant 0 : i32
    %c0_i32_1 = arith.constant 0 : i32
    return %c0_i32, %c0_i32_0 : i32, i32
  }
  func.func @transform_7(%arg0: i32) -> (i32, i32, i32, i32) {
    %c0_i32 = arith.constant 0 : i32
    %c0_i32_0 = arith.constant 0 : i32
    %c0_i32_1 = arith.constant 0 : i32
    %c0_i32_2 = arith.constant 0 : i32
    return %arg0, %c0_i32, %c0_i32_0, %c0_i32_1 : i32, i32, i32, i32
  }
}

</mosaic_0001>

<bundles_post_ra>
// kernel: tpu_custom_call.1
= control target key start
LH: loop header
LB: loop body
LE: loop exit
PB: predicated region body
PF: predicated region fallthrough
CT: control target
= control target key end

     0   :  { %12 = vsyncpa [#allocation3], 0  ;;  %s5446_s0 = inlined_call_operand.vmem [shape: f32[2,18,18,32], index: 0, kind: input, shape index: {}]   ;;  %s5447_s1 = inlined_call_operand.vmem [shape: f32[3,3,32], index: 1, kind: input, shape index: {}]   ;;  %s5448_s2 = inlined_call_operand.vmem [shape: f32[1,32], index: 2, kind: input, shape index: {}]   ;;  %s5449_s3 = inlined_call_operand.vmem [shape: f32[1,32], index: 3, kind: input, shape index: {}]   ;;  %s5450_s4 = inlined_call_operand.vmem [shape: f32[32,32], index: 4, kind: input, shape index: {}]   ;;  %s5451_s5 = inlined_call_operand.vmem [shape: f32[1,32], index: 5, kind: input, shape index: {}]   ;;  %s5452_s6 = inlined_call_operand.vmem [shape: f32[1,32], index: 6, kind: input, shape index: {}]   ;;  %s5453_s7 = inlined_call_operand.hbm [shape: f32[2,16,16,32], index: 7, kind: output, shape index: {}]  }
   0x1   :  { %14 = vsyncpa [#allocation3 + $0x1], 0  ;;  %s3164_s24 = smov 0   ;;  %s3166_s25 = smov 0  }
   0x2   :  { %s3168_s26 = smov 0   ;;  %s3170_s27 = smov 0  }
   0x3 LB: > { %s3185_s28 = sadd.s32 4294967295, %s3119_s27   ;;  %s2818_s29 = sadd.s32 4294967294, %s3119_s27   ;;  %s3119_s27 = sphi %s3170_s27, %s5505_s27   ;;  %s3115_s26 = sphi %s3168_s26, %s5504_s26   ;;  %s3111_s25 = sphi %s3166_s25, %s5503_s25   ;;  %s3107_s24 = sphi %s3164_s24, %s5502_s24  }
   0x4   : > { %s3189_s30 = sadd.s32 1, %s3119_s27   ;;  %s179_s8 = sadd.s32 1, %s3115_s26 }
   0x5   : > { %s176_s9 = ssub.s32 %s3119_s27, %s3189_s30  ;;  %p189_p0 = scmp.ne.s32.totalorder %s3115_s26, %s3111_s25 }
   0x6   : > { %p177_p1 = scmp.eq.s32.totalorder %s176_s9, 0  ;;  %p190_p2 = scmp.eq.s32.totalorder %s3185_s28, 1 }
   0x7   : > { %p195_p3 = scmp.ne.s32.totalorder %s3111_s25, %s3107_s24  ;;  %p196_p4 = scmp.eq.s32.totalorder %s2818_s29, 1 }
   0x8   : > { %s3200_s10 = scalar_select %p177_p1, %s3115_s26, %s179_s8  }
   0x9   : > { %p3202_p5 = por %p190_p2, %p189_p0  ;;  %p3206_p6 = por %p196_p4, %p195_p3 }
   0xa   : > { %p2821_p7 = scmp.ge.s32.totalorder %s3119_s27, 1  ;;  %p240_p8 = scmp.lt.s32.totalorder %s3119_s27, 3 }
   0xc   : > { %p241_p9 = pnand %p2821_p7, %p240_p8 }
   0xd   : > { %p272_p10 = scmp.lt.s32.totalorder (!%p241_p9), %s3185_s28, 1  ;;  %s3121_s16 = smov (!%p241_p9), [#allocation2]  }
   0xe   : > { %244 = sbr.rel (%p241_p9) target bundleno = 568 (0x238), region = 48  ;;  %s3063_s17 = sshll.u32 (!%p241_p9), %s3121_s16, 4  ;;  %s3064_s17 = int_to_ptr.vmem [resolvable:$false] %s3063_s17 }
   0xf   : > { %s3065_s18 = scalar_lea.vmem (!%p241_p9), %s3064_s17, 8192 }
  0x13   : > { %v2117_v0 = vld [vmem:[%s5450_s4 + $0x18] sm:$0xff]  ;;  %v2116_v1 = vld [vmem:[%s5450_s4 + $0x10] sm:$0xff]  ;;  %v334_v2 = vlaneseq  ;;  %v2115_v3 = vld [vmem:[%s5450_s4 + $0x8] sm:$0xff]  ;;  %s273_s19 = scalar_select %p272_p10, %s3185_s28, 1  ;;  %vm502_vm0 = vcmask 1046528   ;;  %vm747_vm1 = vcmask 1045504  }
  0x14   : > { %2902 = vmatprep.subr.mxu0 %v2117_v0  ;;  %2958 = vmatprep.subr.mxu1 %v2117_v0  ;;  %v2114_v5 = vld [vmem:[%s5450_s4] sm:$0xff]  ;;  %v333_v24 = vld [vmem:[%s5447_s1 + $0x8] sm:$0x7]  ;;  %vm2118_vm2 = vcmask 261120  }
  0x15   : > { %2903 = vmatpush3.msra.mxu0 %v2117_v0  ;;  %2962 = vmatpush3.msra.mxu1 %v2117_v0  ;;  %v335_v4 = vshrl.u32 %v334_v2, 7  ;;  %v331_v6 = vld [vmem:[%s5447_s1] sm:$0x7]  ;;  %s2966_s29 = smul.u32 432, %s273_s19  ;;  %v332_v7 = vld [vmem:[%s5447_s1 + $0x4] sm:$0x7] }
  0x16   : > { %2904 = vmatprep.subr.mxu0 %v2116_v1  ;;  %2959 = vmatprep.subr.mxu1 %v2116_v1  ;;  %s269_s19 = sand.u32 1, %s3111_s25  }
  0x17   : > { %2905 = vmatpush3.msra.mxu0 %v2116_v1  ;;  %2963 = vmatpush3.msra.mxu1 %v2116_v1  ;;  %v336_v8 = vsub.s32 0, %v335_v4  ;;  %v404_v9 = vsub.s32 1, %v335_v4  ;;  %v649_v10 = vsub.s32 2, %v335_v4  ;;  %s3235_s15 = scalar_lea.vmem %s5446_s0, %s2966_s29  ;;  %s5173_s22 = sshll.u32 %s269_s19, 8 }
  0x18   : > { %2906 = vmatprep.subr.mxu0 %v2115_v3  ;;  %2960 = vmatprep.subr.mxu1 %v2115_v3  ;;  %v277_v14 = vld [vmem:[%s3235_s15] sm:$0xff]  ;;  %v3245_v15 = vld [vmem:[%s3235_s15 + $0x8] sm:$0xff]  ;;  %v3254_v19 = vld [vmem:[%s3235_s15 + $0x18] sm:$0xff]  ;;  %s5195_s23 = scalar_lea.vmem [#allocation2], %s5173_s22 }
  0x19   : > { %2907 = vmatpush3.msra.mxu0 %v2115_v3  ;;  %2964 = vmatpush3.msra.mxu1 %v2115_v3  ;;  %v3237_v11 = vrot.slane %v331_v6, %v336_v8  ;;  %v3239_v12 = vrot.slane %v331_v6, %v404_v9  ;;  %v3241_v13 = vrot.slane %v331_v6, %v649_v10  ;;  %v3263_v23 = vld [vmem:[%s3235_s15 + $0x20] sm:$0xff]  ;;  %v3296_v41 = vld [vmem:[%s3235_s15 + $0x30] sm:$0xff]  ;;  %v3306_v47 = vld [vmem:[%s3235_s15 + $0xc8] sm:$0xff]  ;;  %s2756_s29 = sshll.u32 %s5195_s23, 4  ;;  %s5398_s29 = int_to_ptr.vmem [resolvable:$true] %s2756_s29 }
  0x1a   : > { %2908 = vmatprep.subr.mxu0 %v2114_v5  ;;  %2961 = vmatprep.subr.mxu1 %v2114_v5  ;;  %v3247_v16 = vrot.slane %v332_v7, %v336_v8  ;;  %v3249_v17 = vrot.slane %v332_v7, %v404_v9  ;;  %v3251_v18 = vrot.slane %v332_v7, %v649_v10  ;;  %v301_v46 = vld [vmem:[%s3235_s15 + $0xc0] sm:$0xff]  ;;  %v3309_v48 = vld [vmem:[%s3235_s15 + $0x38] sm:$0xff]  ;;  %s3059_s14 = scalar_lea.vmem %s5398_s29, 4096  ;;  %p3066_p0 = scmp.lt.s32.totalorder %s5398_s29, %s3064_s17 }
  0x1b   : > { %2909 = vmatpush3.msra.mxu0 %v2114_v5  ;;  %2965 = vmatpush3.msra.mxu1 %v2114_v5  ;;  %v338_v20 = vmul.f32 %v3237_v11, %v277_v14  ;;  %v406_v21 = vmul.f32 %v3239_v12, %v277_v14  ;;  %v3260_v22 = vmul.f32 %v3239_v12, %v3245_v15  ;;  %v3347_v7 = vld [vmem:[%s3235_s15 + $0xd8] sm:$0xff]  ;;  %p3060_p11 = scmp.ne.s32.totalorder %s5398_s29, %s3059_s14  ;;  %p3067_p1 = scmp.lt.s32.totalorder %s3065_s18, %s3059_s14 }
  0x1c   : > { %v651_v25 = vmul.f32 %v3241_v13, %v277_v14  ;;  %v3271_v26 = vmul.f32 %v3241_v13, %v3245_v15  ;;  %v896_v27 = vmul.f32 %v3247_v16, %v3254_v19  ;;  %v964_v28 = vmul.f32 %v3249_v17, %v3254_v19  ;;  %v3357_v14 = vld [vmem:[%s3235_s15 + $0xe0] sm:$0xff] }
  0x1d   : > { %v503_v29 = vrot.slane %v406_v21, 1  ;;  %v504_v30 = vrot.slane %v3260_v22, 1  ;;  %v3280_v31 = vmul.f32 %v3249_v17, %v3263_v23  ;;  %v1208_v32 = vmul.f32 %v3251_v18, %v3254_v19  ;;  %p3061_p12 = pnand %p3060_p11, %p3202_p5  ;;  %p3068_p2 = por %p3067_p1, %p3066_p0 }
  0x1e   : > { %v748_v33 = vrot.slane %v651_v25, 2  ;;  %v749_v34 = vrot.slane %v3271_v26, 2  ;;  %v1060_v35 = vrot.slane %v964_v28, 1  ;;  %v3287_v36 = vmul.f32 %v3251_v18, %v3263_v23 }
  0x1f   : > { %v505_v37 = vsel %vm502_vm0, %v503_v29, %v504_v30  ;;  %v1061_v38 = vrot.slane %v3280_v31, 1  ;;  %v1304_v39 = vrot.slane %v1208_v32, 2  ;;  %v3293_v40 = vrot.slane %v333_v24, %v336_v8  ;;  %p3062_p13 = pneg %p3061_p12 }
  0x20   : > { %v615_v42 = vadd.f32 %v505_v37, %v338_v20  ;;  %v750_v43 = vsel %vm747_vm1, %v748_v33, %v749_v34  ;;  %v1305_v44 = vrot.slane %v3287_v36, 2  ;;  %v3302_v45 = vrot.slane %v333_v24, %v404_v9 }
  0x21   : > { %v1062_v49 = vsel %vm502_vm0, %v1060_v35, %v1061_v38  ;;  %v1452_v50 = vmul.f32 %v3293_v40, %v3296_v41  ;;  %v3316_v51 = vrot.slane %v333_v24, %v649_v10  ;;  %v354_v52 = vmul.f32 %v3237_v11, %v301_v46  ;;  %p3069_p3 = pnand %p3068_p2, %p3062_p13 }
  0x22   : > { %v860_v53 = vadd.f32 %v750_v43, %v615_v42  ;;  %v1306_v54 = vsel %vm747_vm1, %v1304_v39, %v1305_v44  ;;  %v1520_v55 = vmul.f32 %v3302_v45, %v3296_v41  ;;  %v3326_v56 = vmul.f32 %v3302_v45, %v3309_v48  ;;  %v3383_v43 = vld [vmem:[%s3235_s15 + $0xf8] sm:$0xff] }
  0x23   : > { %v1764_v57 = vmul.f32 %v3316_v51, %v3296_v41  ;;  %v3332_v58 = vmul.f32 %v3316_v51, %v3309_v48  ;;  %v430_v59 = vmul.f32 %v3239_v12, %v301_v46  ;;  %v3337_v60 = vmul.f32 %v3239_v12, %v3306_v47 }
  0x24   : > { %v928_v61 = vadd.f32 %v896_v27, %v860_v53  ;;  %v1616_v62 = vrot.slane %v1520_v55, 1  ;;  %v1617_v63 = vrot.slane %v3326_v56, 1  ;;  %v675_v0 = vmul.f32 %v3241_v13, %v301_v46  ;;  %v3367_v27 = vld [vmem:[%s3235_s15 + $0xf0] sm:$0xff] }
  0x25   : > { %v1860_v1 = vrot.slane %v1764_v57, 2  ;;  %v1861_v2 = vrot.slane %v3332_v58, 2  ;;  %v543_v3 = vrot.slane %v430_v59, 1  ;;  %v544_v4 = vrot.slane %v3337_v60, 1 }
  0x26   : > { %v1172_v5 = vadd.f32 %v1062_v49, %v928_v61  ;;  %v1618_v6 = vsel %vm502_vm0, %v1616_v62, %v1617_v63  ;;  %v3351_v8 = vmul.f32 %v3241_v13, %v3306_v47  ;;  %v788_v9 = vrot.slane %v675_v0, 2 }
  0x27   : > { %v1862_v10 = vsel %vm747_vm1, %v1860_v1, %v1861_v2  ;;  %v545_v20 = vsel %vm502_vm0, %v543_v3, %v544_v4  ;;  %v912_v21 = vmul.f32 %v3247_v16, %v3347_v7  ;;  %v988_v24 = vmul.f32 %v3249_v17, %v3347_v7  ;;  %v3405_v1 = vld [vmem:[%s5448_s2] ss:$0 sm:$0xff] }
  0x28   : > { %v1416_v25 = vadd.f32 %v1306_v54, %v1172_v5  ;;  %v631_v28 = vadd.f32 %v545_v20, %v354_v52  ;;  %v789_v29 = vrot.slane %v3351_v8, 2  ;;  %v3372_v32 = vmul.f32 %v3249_v17, %v3357_v14 }
  0x29   : > { %v1100_v33 = vrot.slane %v988_v24, 1  ;;  %v1232_v35 = vmul.f32 %v3251_v18, %v3347_v7  ;;  %v3378_v37 = vmul.f32 %v3251_v18, %v3357_v14  ;;  %v1468_v39 = vmul.f32 %v3293_v40, %v3367_v27 }
  0x2a   : > { %v1484_v42 = vadd.f32 %v1452_v50, %v1416_v25  ;;  %v790_v46 = vsel %vm747_vm1, %v788_v9, %v789_v29  ;;  %v1101_v49 = vrot.slane %v3372_v32, 1  ;;  %v1544_v52 = vmul.f32 %v3302_v45, %v3367_v27  ;;  %v279_v50 = vld [vmem:[%s3235_s15 + $0x10] sm:$0x3] }
  0x2b   : > { %v876_v53 = vadd.f32 %v790_v46, %v631_v28  ;;  %v1344_v54 = vrot.slane %v1232_v35, 2  ;;  %v1345_v55 = vrot.slane %v3378_v37, 2  ;;  %v3394_v57 = vmul.f32 %v3302_v45, %v3383_v43 }
  0x2c   : > { %v1728_v59 = vadd.f32 %v1618_v6, %v1484_v42  ;;  %v1102_v61 = vsel %vm502_vm0, %v1100_v33, %v1101_v49  ;;  %v1656_v62 = vrot.slane %v1544_v52, 1  ;;  %v1788_v0 = vmul.f32 %v3316_v51, %v3367_v27 }
  0x2d   : > { %v944_v3 = vadd.f32 %v912_v21, %v876_v53  ;;  %v1346_v5 = vsel %vm747_vm1, %v1344_v54, %v1345_v55  ;;  %v5454_v6 = vrot.slane %v3394_v57, 1  ;;  %v3413_v9 = vmul.f32 %v3316_v51, %v3383_v43  ;;  %v3421_v21 = vld [vmem:[%s5449_s3] ss:$0 sm:$0xff] }
  0x2e   : > { %v1972_v20 = vadd.f32 %v1862_v10, %v1728_v59  ;;  %v1900_v24 = vrot.slane %v1788_v0, 2  ;;  %v339_v25 = vmul.f32 %v3237_v11, %v3245_v15  ;;  %v408_v28 = vmul.f32 %v3239_v12, %v279_v50  ;;  %v3428_v10 = vld [vmem:[%s3235_s15 + $0x28] sm:$0x3] }
  0x2f   : > { %v1188_v33 = vadd.f32 %v1102_v61, %v944_v3  ;;  %v1658_v35 = vsel %vm502_vm0, %v1656_v62, %v5454_v6  ;;  %v5455_v42 = vrot.slane %v3413_v9, 2  ;;  %v653_v46 = vmul.f32 %v3241_v13, %v279_v50 }
  0x30   : > { %v2011_v15 = vmul.f32 %v3405_v1, %v1972_v20  ;;  %v506_v52 = vrot.slane %v408_v28, 1  ;;  %v897_v53 = vmul.f32 %v3247_v16, %v3263_v23  ;;  %v966_v54 = vmul.f32 %v3249_v17, %v3428_v10 }
  0x31   : > { %v1432_v59 = vadd.f32 %v1346_v5, %v1188_v33  ;;  %v1902_v61 = vsel %vm747_vm1, %v1900_v24, %v5455_v42  ;;  %v751_v62 = vrot.slane %v653_v46, 2  ;;  %v1210_v0 = vmul.f32 %v3251_v18, %v3428_v10  ;;  %v3448_v5 = vld [vmem:[%s3235_s15 + $0x40] sm:$0x3]  ;;  %v303_v42 = vld [vmem:[%s3235_s15 + $0xd0] sm:$0x3] }
  0x32   : > { %v2050_v50 = vadd.f32 %v3421_v21, %v2011_v15  ;;  %v507_v3 = vsel %vm502_vm0, %v504_v30, %v506_v52  ;;  %v1063_v20 = vrot.slane %v966_v54, 1  ;;  %v1453_v28 = vmul.f32 %v3293_v40, %v3309_v48 }
  0x33   : > { %v1500_v6 = vadd.f32 %v1468_v39, %v1432_v59  ;;  %v616_v33 = vadd.f32 %v507_v3, %v339_v25  ;;  %v752_v24 = vsel %vm747_vm1, %v749_v34, %v751_v62  ;;  %v1307_v46 = vrot.slane %v1210_v0, 2  ;;  %v3468_v25 = vld [vmem:[%s3235_s15 + $0xe8] sm:$0x3] }
  0x34   : > { %v2082_v15 = vmax.f32 %v2050_v50, 0.0  ;;  %v1064_v22 = vsel %vm502_vm0, %v1061_v38, %v1063_v20  ;;  %v1522_v30 = vmul.f32 %v3302_v45, %v3448_v5  ;;  %v1766_v39 = vmul.f32 %v3316_v51, %v3448_v5 }
  0x35   : > { %v1744_v52 = vadd.f32 %v1658_v35, %v1500_v6  ;;  %v861_v54 = vadd.f32 %v752_v24, %v616_v33  ;;  %v1308_v26 = vsel %vm747_vm1, %v1305_v44, %v1307_v46  ;;  %v355_v34 = vmul.f32 %v3237_v11, %v3306_v47 }
  0x36   : > { %2910 = vmatprep.mubr.msk.f32.mxu0 %vm2118_vm2, %v2082_v15  ;;  %v1619_v31 = vrot.slane %v1522_v30, 1  ;;  %v1863_v38 = vrot.slane %v1766_v39, 2  ;;  %v432_v59 = vmul.f32 %v3239_v12, %v303_v42  ;;  %v677_v62 = vmul.f32 %v3241_v13, %v303_v42 }
  0x37   : > { %v1988_v6 = vadd.f32 %v1902_v61, %v1744_v52  ;;  %v929_v35 = vadd.f32 %v897_v53, %v861_v54  ;;  %v913_v36 = vmul.f32 %v3247_v16, %v3357_v14  ;;  %v990_v44 = vmul.f32 %v3249_v17, %v3468_v25  ;;  %v3484_v53 = vld [vmem:[%s3235_s15 + $0x100] sm:$0x3] }
  0x38   : > { %v1620_v47 = vsel %vm502_vm0, %v1617_v63, %v1619_v31  ;;  %v1864_v0 = vsel %vm747_vm1, %v1861_v2, %v1863_v38  ;;  %v546_v50 = vrot.slane %v432_v59, 1  ;;  %v791_v3 = vrot.slane %v677_v62, 2 }
  0x39   : > { %v2027_v42 = vmul.f32 %v3405_v1, %v1988_v6  ;;  %v1173_v61 = vadd.f32 %v1064_v22, %v929_v35  ;;  %v1103_v20 = vrot.slane %v990_v44, 1  ;;  %v1234_v33 = vmul.f32 %v3251_v18, %v3468_v25 }
  0x3a   : > { %v547_v56 = vsel %vm502_vm0, %v544_v4, %v546_v50  ;;  %v792_v58 = vsel %vm747_vm1, %v789_v29, %v791_v3  ;;  %v1469_v63 = vmul.f32 %v3293_v40, %v3383_v43  ;;  %v1546_v2 = vmul.f32 %v3302_v45, %v3484_v53 }
  0x3b   : > { %v2066_v24 = vadd.f32 %v3421_v21, %v2027_v42  ;;  %v1417_v46 = vadd.f32 %v1308_v26, %v1173_v61  ;;  %v632_v15 = vadd.f32 %v547_v56, %v355_v34  ;;  %v1104_v60 = vsel %vm502_vm0, %v1101_v49, %v1103_v20  ;;  %v3545_v56 = vld [vmem:[%s3235_s15 + $0x48] sm:$0xff] }
  0x3c   : > { %v1347_v22 = vrot.slane %v1234_v33, 2  ;;  %v1659_v4 = vrot.slane %v1546_v2, 1  ;;  %v1790_v8 = vmul.f32 %v3316_v51, %v3484_v53  ;;  %v340_v29 = vmul.f32 %v3237_v11, %v3254_v19 }
  0x3d   : > { %v2098_v30 = vmax.f32 %v2066_v24, 0.0  ;;  %v1485_v39 = vadd.f32 %v1453_v28, %v1417_v46  ;;  %v877_v52 = vadd.f32 %v792_v58, %v632_v15  ;;  %v409_v54 = vmul.f32 %v3239_v12, %v3254_v19 }
  0x3e   : > { %v1348_v32 = vsel %vm747_vm1, %v1345_v55, %v1347_v22  ;;  %v5479_v49 = vrot.slane %v3394_v57, 1  ;;  %v1903_v34 = vrot.slane %v1790_v8, 2  ;;  %v3516_v31 = vmul.f32 %v3239_v12, %v3263_v23  ;;  %v3557_v22 = vld [vmem:[%s3235_s15 + $0x50] sm:$0xff] }
  0x3f   : > { %2934 = vmatprep.mubr.msk.f32.mxu1 %vm2118_vm2, %v2098_v30  ;;  %v1729_v28 = vadd.f32 %v1620_v47, %v1485_v39  ;;  %v945_v38 = vadd.f32 %v913_v36, %v877_v52  ;;  %v508_v59 = vrot.slane %v409_v54, 1  ;;  %v654_v62 = vmul.f32 %v3241_v13, %v3254_v19 }
  0x40   : > { %v1660_v26 = vsel %vm502_vm0, %v5479_v49, %v1659_v4  ;;  %v5480_v37 = vrot.slane %v3413_v9, 2  ;;  %v509_v57 = vrot.slane %v3516_v31, 1  ;;  %v3527_v6 = vmul.f32 %v3241_v13, %v3263_v23 }
  0x41   : > { %v898_v35 = vmul.f32 %v3247_v16, %v3296_v41  ;;  %v1973_v44 = vadd.f32 %v1864_v0, %v1729_v28  ;;  %v1189_v36 = vadd.f32 %v1104_v60, %v945_v38  ;;  %v753_v47 = vrot.slane %v654_v62, 2 }
  0x42   : > { %v1904_v55 = vsel %vm747_vm1, %v5480_v37, %v1903_v34  ;;  %v967_v19 = vmul.f32 %v3249_v17, %v3296_v41  ;;  %v510_v9 = vsel %vm502_vm0, %v508_v59, %v509_v57  ;;  %v754_v50 = vrot.slane %v3527_v6, 2 }
  0x43   : > { %v3539_v3 = vmul.f32 %v3249_v17, %v3309_v48  ;;  %v1211_v42 = vmul.f32 %v3251_v18, %v3296_v41  ;;  %v2012_v0 = vmul.f32 %v3405_v1, %v1973_v44  ;;  %v1433_v61 = vadd.f32 %v1348_v32, %v1189_v36 }
  0x44   : > { %v617_v20 = vadd.f32 %v510_v9, %v340_v29  ;;  %v1065_v33 = vrot.slane %v967_v19, 1  ;;  %v755_v58 = vsel %vm747_vm1, %v753_v47, %v754_v50  ;;  %v3553_v24 = vmul.f32 %v3251_v18, %v3309_v48 }
  0x45   : > { %v1066_v2 = vrot.slane %v3539_v3, 1  ;;  %v1309_v46 = vrot.slane %v1211_v42, 2  ;;  %v2051_v15 = vadd.f32 %v3421_v21, %v2012_v0  ;;  %v1501_v60 = vadd.f32 %v1469_v63, %v1433_v61 }
  0x46   : > { %v862_v4 = vadd.f32 %v755_v58, %v617_v20  ;;  %v1454_v8 = vmul.f32 %v3293_v40, %v3545_v56  ;;  %v1310_v30 = vrot.slane %v3553_v24, 2  ;;  %v1523_v39 = vmul.f32 %v3302_v45, %v3545_v56 }
  0x47   : > { %v1067_v29 = vsel %vm502_vm0, %v1065_v33, %v1066_v2  ;;  %v3569_v52 = vmul.f32 %v3302_v45, %v3557_v22  ;;  %v2083_v63 = vmax.f32 %v2051_v15, 0.0  ;;  %v1745_v54 = vadd.f32 %v1660_v26, %v1501_v60 }
  0x48   : > { %v930_v32 = vadd.f32 %v898_v35, %v862_v4  ;;  %v1767_v49 = vmul.f32 %v3316_v51, %v3545_v56  ;;  %v1311_v34 = vsel %vm747_vm1, %v1309_v46, %v1310_v30  ;;  %v1621_v28 = vrot.slane %v1523_v39, 1 }
  0x49   : > { %v1622_v38 = vrot.slane %v3569_v52, 1  ;;  %v3579_v59 = vmul.f32 %v3316_v51, %v3557_v22  ;;  %2911 = vmatmul.mubr.msk.f32.vlgmr.msra.gmra.mxu0 %vm2118_vm2, %v2083_v63  ;;  %v1989_v62 = vadd.f32 %v1904_v55, %v1745_v54  ;;  %v356_v35 = vmul.f32 %v3237_v11, %v3347_v7 }
  0x4a   : > { %v1174_v37 = vadd.f32 %v1067_v29, %v930_v32  ;;  %v1865_v26 = vrot.slane %v1767_v49, 2  ;;  %v433_v47 = vmul.f32 %v3239_v12, %v3347_v7  ;;  %v3592_v19 = vmul.f32 %v3239_v12, %v3357_v14 }
  0x4b   : > { %v1623_v44 = vsel %vm502_vm0, %v1621_v28, %v1622_v38  ;;  %v1866_v36 = vrot.slane %v3579_v59, 2  ;;  %v2028_v55 = vmul.f32 %v3405_v1, %v1989_v62  ;;  %v678_v42 = vmul.f32 %v3241_v13, %v3347_v7 }
  0x4c   : > { %v1418_v9 = vadd.f32 %v1311_v34, %v1174_v37  ;;  %v3599_v0 = vmul.f32 %v3241_v13, %v3357_v14  ;;  %v548_v20 = vrot.slane %v433_v47, 1  ;;  %v549_v33 = vrot.slane %v3592_v19, 1  ;;  %v3624_v34 = vld [vmem:[%s3235_s15 + $0x108] sm:$0xff] }
  0x4d   : > { %v1867_v61 = vsel %vm747_vm1, %v1865_v26, %v1866_v36  ;;  %v914_v58 = vmul.f32 %v3247_v16, %v3367_v27  ;;  %v2067_v46 = vadd.f32 %v3421_v21, %v2028_v55  ;;  %v793_v60 = vrot.slane %v678_v42, 2  ;;  %v3633_v55 = vld [vmem:[%s3235_s15 + $0x110] sm:$0xff] }
  0x4e   : > { %v1486_v15 = vadd.f32 %v1454_v8, %v1418_v9  ;;  %v5459_v7 = vrot.slane %v3599_v0, 2  ;;  %v550_v4 = vsel %vm502_vm0, %v548_v20, %v549_v33  ;;  %v991_v29 = vmul.f32 %v3249_v17, %v3367_v27 }
  0x4f   : > { %v3616_v39 = vmul.f32 %v3249_v17, %v3383_v43  ;;  %v1235_v63 = vmul.f32 %v3251_v18, %v3367_v27  ;;  %v2099_v54 = vmax.f32 %v2067_v46, 0.0  ;;  %v633_v32 = vadd.f32 %v550_v4, %v356_v35 }
  0x50   : > { %v1730_v8 = vadd.f32 %v1623_v44, %v1486_v15  ;;  %v795_v49 = vsel %vm747_vm1, %v793_v60, %v5459_v7  ;;  %v1105_v28 = vrot.slane %v991_v29, 1  ;;  %v3629_v37 = vmul.f32 %v3251_v18, %v3383_v43 }
  0x51   : > { %v5457_v62 = vrot.slane %v3616_v39, 1  ;;  %v1349_v26 = vrot.slane %v1235_v63, 2  ;;  %2935 = vmatmul.mubr.msk.f32.vlgmr.msra.gmra.mxu1 %vm2118_vm2, %v2099_v54  ;;  %v878_v35 = vadd.f32 %v795_v49, %v633_v32  ;;  %v1470_v44 = vmul.f32 %v3293_v40, %v3624_v34 }
  0x52   : > { %v1974_v47 = vadd.f32 %v1867_v61, %v1730_v8  ;;  %v1547_v9 = vmul.f32 %v3302_v45, %v3624_v34  ;;  %v5456_v20 = vrot.slane %v3629_v37, 2  ;;  %v3645_v46 = vmul.f32 %v3302_v45, %v3633_v55 }
  0x53   : > { %v1107_v42 = vsel %vm502_vm0, %v1105_v28, %v5457_v62  ;;  %v1791_v61 = vmul.f32 %v3316_v51, %v3624_v34  ;;  %v946_v60 = vadd.f32 %v914_v58, %v878_v35  ;;  %v3652_v29 = vmul.f32 %v3316_v51, %v3633_v55 }
  0x54   : > { %v2013_v15 = vmul.f32 %v3405_v1, %v1974_v47  ;;  %v1661_v4 = vrot.slane %v1547_v9, 1  ;;  %v1351_v63 = vsel %vm747_vm1, %v1349_v26, %v5456_v20  ;;  %v5458_v54 = vrot.slane %v3645_v46, 1  ;;  %v3677_v20 = vld [vmem:[%s3235_s15 + $0x58] sm:$0x3] }
  0x55   : > { %v1905_v8 = vrot.slane %v1791_v61, 2  ;;  %v341_v32 = vmul.f32 %v3237_v11, %v3263_v23  ;;  %v1190_v28 = vadd.f32 %v1107_v42, %v946_v60  ;;  %v1906_v58 = vrot.slane %v3652_v29, 2 }
  0x56   : > { %v2052_v49 = vadd.f32 %v3421_v21, %v2013_v15  ;;  %v411_v47 = vmul.f32 %v3239_v12, %v3428_v10  ;;  %v1663_v35 = vsel %vm502_vm0, %v1661_v4, %v5458_v54  ;;  %v656_v26 = vmul.f32 %v3241_v13, %v3428_v10 }
  0x57   : > { %v899_v9 = vmul.f32 %v3247_v16, %v3309_v48  ;;  %v969_v23 = vmul.f32 %v3249_v17, %v3448_v5  ;;  %v1434_v42 = vadd.f32 %v1351_v63, %v1190_v28  ;;  %v1907_v15 = vsel %vm747_vm1, %v1905_v8, %v1906_v58 }
  0x58   : > { %v2084_v61 = vmax.f32 %v2052_v49, 0.0  ;;  %v511_v60 = vrot.slane %v411_v47, 1  ;;  %v756_v62 = vrot.slane %v656_v26, 2  ;;  %v1213_v10 = vmul.f32 %v3251_v18, %v3448_v5 }
  0x59   : > { %v1068_v4 = vrot.slane %v969_v23, 1  ;;  %v1455_v54 = vmul.f32 %v3293_v40, %v3557_v22  ;;  %v1502_v7 = vadd.f32 %v1470_v44, %v1434_v42  ;;  %v1525_v8 = vmul.f32 %v3302_v45, %v3677_v20 }
  0x5a   : > { %2913 = vmatprep.mubr.msk.f32.mxu0 %vm2118_vm2, %v2084_v61  ;;  %v512_v63 = vsel %vm502_vm0, %v509_v57, %v511_v60  ;;  %v1769_v49 = vmul.f32 %v3316_v51, %v3677_v20  ;;  %v757_v47 = vsel %vm747_vm1, %v754_v50, %v756_v62  ;;  %v1312_v26 = vrot.slane %v1213_v10, 2 }
  0x5b   : > { %v618_v28 = vadd.f32 %v512_v63, %v341_v32  ;;  %v1069_v44 = vsel %vm502_vm0, %v1066_v2, %v1068_v4  ;;  %v1746_v31 = vadd.f32 %v1663_v35, %v1502_v7  ;;  %v1624_v23 = vrot.slane %v1525_v8, 1 }
  0x5c   : > { %v1868_v57 = vrot.slane %v1769_v49, 2  ;;  %v357_v61 = vmul.f32 %v3237_v11, %v3357_v14  ;;  %v1313_v32 = vsel %vm747_vm1, %v1310_v30, %v1312_v26  ;;  %v435_v6 = vmul.f32 %v3239_v12, %v3468_v25  ;;  %v3715_v30 = vld [vmem:[%s3235_s15 + $0x118] sm:$0x3] }
  0x5d   : > { %v863_v42 = vadd.f32 %v757_v47, %v618_v28  ;;  %v680_v50 = vmul.f32 %v3241_v13, %v3468_v25  ;;  %v1990_v3 = vadd.f32 %v1907_v15, %v1746_v31  ;;  %v1625_v2 = vsel %vm502_vm0, %v1622_v38, %v1624_v23 }
  0x5e   : > { %v1869_v14 = vsel %vm747_vm1, %v1866_v36, %v1868_v57  ;;  %v915_v24 = vmul.f32 %v3247_v16, %v3383_v43  ;;  %v551_v62 = vrot.slane %v435_v6, 1  ;;  %v993_v25 = vmul.f32 %v3249_v17, %v3484_v53 }
  0x5f   : > { %v931_v7 = vadd.f32 %v899_v9, %v863_v42  ;;  %v796_v35 = vrot.slane %v680_v50, 2  ;;  %v2029_v15 = vmul.f32 %v3405_v1, %v1990_v3  ;;  %v1237_v52 = vmul.f32 %v3251_v18, %v3484_v53 }
  0x60   : > { %v1471_v38 = vmul.f32 %v3293_v40, %v3633_v55  ;;  %v1549_v59 = vmul.f32 %v3302_v45, %v3715_v30  ;;  %v552_v9 = vsel %vm502_vm0, %v549_v33, %v551_v62  ;;  %v5481_v60 = vrot.slane %v3599_v0, 2 }
  0x61   : > { %v1175_v36 = vadd.f32 %v1069_v44, %v931_v7  ;;  %v1108_v10 = vrot.slane %v993_v25, 1  ;;  %v2068_v63 = vadd.f32 %v3421_v21, %v2029_v15  ;;  %v634_v8 = vadd.f32 %v552_v9, %v357_v61 }
  0x62   : > { %v797_v4 = vsel %vm747_vm1, %v5481_v60, %v796_v35  ;;  %v1352_v49 = vrot.slane %v1237_v52, 2  ;;  %v1664_v28 = vrot.slane %v1549_v59, 1  ;;  %v5482_v26 = vrot.slane %v3616_v39, 1 }
  0x63   : > { %v1419_v47 = vadd.f32 %v1313_v32, %v1175_v36  ;;  %v1793_v19 = vmul.f32 %v3316_v51, %v3715_v30  ;;  %v342_v33 = vmul.f32 %v3237_v11, %v3296_v41  ;;  %v2100_v0 = vmax.f32 %v2068_v63, 0.0 }
  0x64   : > { %v1109_v31 = vsel %vm502_vm0, %v5482_v26, %v1108_v10  ;;  %v879_v44 = vadd.f32 %v797_v4, %v634_v8  ;;  %v5483_v23 = vrot.slane %v3629_v37, 2  ;;  %v5484_v61 = vrot.slane %v3645_v46, 1  ;;  %v3782_v10 = vld [vmem:[%s3235_s15 + $0x60] sm:$0xff] }
  0x65   : > { %v1487_v32 = vadd.f32 %v1455_v54, %v1419_v47  ;;  %v1908_v39 = vrot.slane %v1793_v19, 2  ;;  %v412_v6 = vmul.f32 %v3239_v12, %v3296_v41  ;;  %v3750_v50 = vmul.f32 %v3239_v12, %v3309_v48  ;;  %2937 = vmatprep.mubr.msk.f32.mxu1 %vm2118_vm2, %v2100_v0  ;;  %v3790_v47 = vld [vmem:[%s3235_s15 + $0x68] sm:$0xff] }
  0x66   : > { %v1353_v57 = vsel %vm747_vm1, %v5483_v23, %v1352_v49  ;;  %v1665_v42 = vsel %vm502_vm0, %v5484_v61, %v1664_v28  ;;  %v947_v3 = vadd.f32 %v915_v24, %v879_v44  ;;  %v657_v37 = vmul.f32 %v3241_v13, %v3296_v41 }
  0x67   : > { %v3757_v46 = vmul.f32 %v3241_v13, %v3309_v48  ;;  %v900_v54 = vmul.f32 %v3247_v16, %v3545_v56  ;;  %v1731_v7 = vadd.f32 %v1625_v2, %v1487_v32  ;;  %v1909_v62 = vsel %vm747_vm1, %v1906_v58, %v1908_v39 }
  0x68   : > { %v513_v35 = vrot.slane %v412_v6, 1  ;;  %v514_v25 = vrot.slane %v3750_v50, 1  ;;  %v1191_v24 = vadd.f32 %v1109_v31, %v947_v3  ;;  %v758_v15 = vrot.slane %v657_v37, 2 }
  0x69   : > { %v759_v41 = vrot.slane %v3757_v46, 2  ;;  %v970_v52 = vmul.f32 %v3249_v17, %v3545_v56  ;;  %v1975_v59 = vadd.f32 %v1869_v14, %v1731_v7  ;;  %v3773_v29 = vmul.f32 %v3249_v17, %v3557_v22 }
  0x6a   : > { %v515_v2 = vsel %vm502_vm0, %v513_v35, %v514_v25  ;;  %v1214_v58 = vmul.f32 %v3251_v18, %v3545_v56  ;;  %v1435_v36 = vadd.f32 %v1353_v57, %v1191_v24  ;;  %v3787_v8 = vmul.f32 %v3251_v18, %v3557_v22 }
  0x6b   : > { %v619_v9 = vadd.f32 %v515_v2, %v342_v33  ;;  %v760_v60 = vsel %vm747_vm1, %v758_v15, %v759_v41  ;;  %v1070_v4 = vrot.slane %v970_v52, 1  ;;  %v2014_v14 = vmul.f32 %v3405_v1, %v1975_v59 }
  0x6c   : > { %v1071_v63 = vrot.slane %v3773_v29, 1  ;;  %v1314_v49 = vrot.slane %v1214_v58, 2  ;;  %v1503_v28 = vadd.f32 %v1471_v38, %v1435_v36  ;;  %v1456_v31 = vmul.f32 %v3293_v40, %v3782_v10 }
  0x6d   : > { %v864_v26 = vadd.f32 %v760_v60, %v619_v9  ;;  %v1526_v19 = vmul.f32 %v3302_v45, %v3782_v10  ;;  %v2053_v33 = vadd.f32 %v3421_v21, %v2014_v14  ;;  %v1315_v44 = vrot.slane %v3787_v8, 2 }
  0x6e   : > { %v1072_v0 = vsel %vm502_vm0, %v1070_v4, %v1071_v63  ;;  %v3803_v38 = vmul.f32 %v3302_v45, %v3790_v47  ;;  %v1747_v23 = vadd.f32 %v1665_v42, %v1503_v28  ;;  %v1770_v32 = vmul.f32 %v3316_v51, %v3782_v10 }
  0x6f   : > { %v932_v57 = vadd.f32 %v900_v54, %v864_v26  ;;  %v1626_v61 = vrot.slane %v1526_v19, 1  ;;  %v2085_v39 = vmax.f32 %v2053_v33, 0.0  ;;  %v1316_v6 = vsel %vm747_vm1, %v1314_v49, %v1315_v44 }
  0x70   : > { %v1627_v3 = vrot.slane %v3803_v38, 1  ;;  %v3813_v37 = vmul.f32 %v3316_v51, %v3790_v47  ;;  %v1991_v7 = vadd.f32 %v1909_v62, %v1747_v23  ;;  %v1870_v24 = vrot.slane %v1770_v32, 2 }
  0x71   : > { %v1176_v35 = vadd.f32 %v1072_v0, %v932_v57  ;;  %v358_v42 = vmul.f32 %v3237_v11, %v3367_v27  ;;  %2914 = vmatmul.mubr.msk.f32.gmra.mxu0 %vm2118_vm2, %v2085_v39  ;;  %v436_v52 = vmul.f32 %v3239_v12, %v3367_v27  ;;  %v3826_v59 = vmul.f32 %v3239_v12, %v3383_v43  ;;  %v3858_v39 = vld [vmem:[%s3235_s15 + $0x120] sm:$0xff] }
  0x72   : > { %v1628_v54 = vsel %vm502_vm0, %v1626_v61, %v1627_v3  ;;  %v1871_v15 = vrot.slane %v3813_v37, 2  ;;  %v2030_v62 = vmul.f32 %v3405_v1, %v1991_v7  ;;  %v681_v58 = vmul.f32 %v3241_v13, %v3367_v27 }
  0x73   : > { %v1420_v2 = vadd.f32 %v1316_v6, %v1176_v35  ;;  %v3833_v36 = vmul.f32 %v3241_v13, %v3383_v43  ;;  %v553_v60 = vrot.slane %v436_v52, 1  ;;  %v554_v4 = vrot.slane %v3826_v59, 1 }
  0x74   : > { %v1872_v9 = vsel %vm747_vm1, %v1870_v24, %v1871_v15  ;;  %v916_v14 = vmul.f32 %v3247_v16, %v3624_v34  ;;  %v2069_v49 = vadd.f32 %v3421_v21, %v2030_v62  ;;  %v798_v26 = vrot.slane %v681_v58, 2  ;;  %v3867_v62 = vld [vmem:[%s3235_s15 + $0x128] sm:$0xff] }
  0x75   : > { %v1488_v28 = vadd.f32 %v1456_v31, %v1420_v2  ;;  %v5463_v27 = vrot.slane %v3833_v36, 2  ;;  %v555_v19 = vsel %vm502_vm0, %v553_v60, %v554_v4  ;;  %v994_v33 = vmul.f32 %v3249_v17, %v3624_v34 }
  0x76   : > { %v3850_v0 = vmul.f32 %v3249_v17, %v3633_v55  ;;  %v1238_v23 = vmul.f32 %v3251_v18, %v3624_v34  ;;  %v2101_v57 = vmax.f32 %v2069_v49, 0.0  ;;  %v635_v61 = vadd.f32 %v555_v19, %v358_v42 }
  0x77   : > { %v1732_v31 = vadd.f32 %v1628_v54, %v1488_v28  ;;  %v800_v32 = vsel %vm747_vm1, %v798_v26, %v5463_v27  ;;  %v1110_v6 = vrot.slane %v994_v33, 1  ;;  %v3863_v35 = vmul.f32 %v3251_v18, %v3633_v55 }
  0x78   : > { %v5461_v7 = vrot.slane %v3850_v0, 1  ;;  %v1354_v24 = vrot.slane %v1238_v23, 2  ;;  %2938 = vmatmul.mubr.msk.f32.gmra.mxu1 %vm2118_vm2, %v2101_v57  ;;  %v880_v42 = vadd.f32 %v800_v32, %v635_v61  ;;  %v1472_v54 = vmul.f32 %v3293_v40, %v3858_v39 }
  0x79   : > { %v1976_v52 = vadd.f32 %v1872_v9, %v1732_v31  ;;  %v1550_v2 = vmul.f32 %v3302_v45, %v3858_v39  ;;  %v5460_v60 = vrot.slane %v3863_v35, 2  ;;  %v3879_v49 = vmul.f32 %v3302_v45, %v3867_v62 }
  0x7a   : > { %v1112_v58 = vsel %vm502_vm0, %v1110_v6, %v5461_v7  ;;  %v1794_v9 = vmul.f32 %v3316_v51, %v3858_v39  ;;  %v948_v26 = vadd.f32 %v916_v14, %v880_v42  ;;  %v3886_v33 = vmul.f32 %v3316_v51, %v3867_v62 }
  0x7b   : > { %v2015_v28 = vmul.f32 %v3405_v1, %v1976_v52  ;;  %v1666_v19 = vrot.slane %v1550_v2, 1  ;;  %v1356_v23 = vsel %vm747_vm1, %v1354_v24, %v5460_v60  ;;  %v5462_v57 = vrot.slane %v3879_v49, 1  ;;  %v3911_v60 = vld [vmem:[%s3235_s15 + $0x70] sm:$0x3] }
  0x7c   : > { %v1910_v31 = vrot.slane %v1794_v9, 2  ;;  %v343_v61 = vmul.f32 %v3237_v11, %v3309_v48  ;;  %v1192_v6 = vadd.f32 %v1112_v58, %v948_v26  ;;  %v1911_v14 = vrot.slane %v3886_v33, 2 }
  0x7d   : > { %v2054_v32 = vadd.f32 %v3421_v21, %v2015_v28  ;;  %v414_v52 = vmul.f32 %v3239_v12, %v3448_v5  ;;  %v1668_v42 = vsel %vm502_vm0, %v1666_v19, %v5462_v57  ;;  %v659_v24 = vmul.f32 %v3241_v13, %v3448_v5 }
  0x7e   : > { %v901_v2 = vmul.f32 %v3247_v16, %v3557_v22  ;;  %v972_v48 = vmul.f32 %v3249_v17, %v3677_v20  ;;  %v1436_v58 = vadd.f32 %v1356_v23, %v1192_v6  ;;  %v1912_v28 = vsel %vm747_vm1, %v1910_v31, %v1911_v14 }
  0x7f   : > { %v2086_v9 = vmax.f32 %v2054_v32, 0.0  ;;  %v516_v26 = vrot.slane %v414_v52, 1  ;;  %v761_v7 = vrot.slane %v659_v24, 2  ;;  %v1216_v5 = vmul.f32 %v3251_v18, %v3677_v20 }
  0x80   : > { %v1073_v19 = vrot.slane %v972_v48, 1  ;;  %v1457_v57 = vmul.f32 %v3293_v40, %v3790_v47  ;;  %v1504_v27 = vadd.f32 %v1472_v54, %v1436_v58  ;;  %v1528_v31 = vmul.f32 %v3302_v45, %v3911_v60 }
  0x81   : > { %2916 = vmatprep.mubr.msk.f32.mxu0 %vm2118_vm2, %v2086_v9  ;;  %v517_v23 = vsel %vm502_vm0, %v514_v25, %v516_v26  ;;  %v1772_v32 = vmul.f32 %v3316_v51, %v3911_v60  ;;  %v762_v52 = vsel %vm747_vm1, %v759_v41, %v761_v7  ;;  %v1317_v24 = vrot.slane %v1216_v5, 2 }
  0x82   : > { %v620_v6 = vadd.f32 %v517_v23, %v343_v61  ;;  %v1074_v54 = vsel %vm502_vm0, %v1071_v63, %v1073_v19  ;;  %v1748_v50 = vadd.f32 %v1668_v42, %v1504_v27  ;;  %v1629_v48 = vrot.slane %v1528_v31, 1 }
  0x83   : > { %v1873_v25 = vrot.slane %v1772_v32, 2  ;;  %v359_v9 = vmul.f32 %v3237_v11, %v3383_v43  ;;  %v1318_v61 = vsel %vm747_vm1, %v1315_v44, %v1317_v24  ;;  %v438_v46 = vmul.f32 %v3239_v12, %v3484_v53  ;;  %v3949_v44 = vld [vmem:[%s3235_s15 + $0x130] sm:$0x3] }
  0x84   : > { %v865_v58 = vadd.f32 %v762_v52, %v620_v6  ;;  %v683_v41 = vmul.f32 %v3241_v13, %v3484_v53  ;;  %v1992_v29 = vadd.f32 %v1912_v28, %v1748_v50  ;;  %v1630_v63 = vsel %vm502_vm0, %v1627_v3, %v1629_v48 }
  0x85   : > { %v1874_v43 = vsel %vm747_vm1, %v1871_v15, %v1873_v25  ;;  %v917_v8 = vmul.f32 %v3247_v16, %v3633_v55  ;;  %v556_v7 = vrot.slane %v438_v46, 1  ;;  %v996_v53 = vmul.f32 %v3249_v17, %v3715_v30 }
  0x86   : > { %v933_v27 = vadd.f32 %v901_v2, %v865_v58  ;;  %v801_v42 = vrot.slane %v683_v41, 2  ;;  %v2031_v28 = vmul.f32 %v3405_v1, %v1992_v29  ;;  %v1240_v38 = vmul.f32 %v3251_v18, %v3715_v30 }
  0x87   : > { %v1473_v3 = vmul.f32 %v3293_v40, %v3867_v62  ;;  %v1552_v37 = vmul.f32 %v3302_v45, %v3949_v44  ;;  %v557_v2 = vsel %vm502_vm0, %v554_v4, %v556_v7  ;;  %v5485_v26 = vrot.slane %v3833_v36, 2 }
  0x88   : > { %v1177_v15 = vadd.f32 %v1074_v54, %v933_v27  ;;  %v1113_v5 = vrot.slane %v996_v53, 1  ;;  %v2070_v23 = vadd.f32 %v3421_v21, %v2031_v28  ;;  %v636_v31 = vadd.f32 %v557_v2, %v359_v9 }
  0x89   : > { %v802_v19 = vsel %vm747_vm1, %v5485_v26, %v801_v42  ;;  %v1357_v32 = vrot.slane %v1240_v38, 2  ;;  %v1669_v6 = vrot.slane %v1552_v37, 1  ;;  %v5486_v24 = vrot.slane %v3850_v0, 1 }
  0x8a   : > { %v1421_v52 = vadd.f32 %v1318_v61, %v1177_v15  ;;  %v1796_v59 = vmul.f32 %v3316_v51, %v3949_v44  ;;  %v344_v4 = vmul.f32 %v3237_v11, %v3545_v56  ;;  %v2102_v36 = vmax.f32 %v2070_v23, 0.0 }
  0x8b   : > { %v1114_v50 = vsel %vm502_vm0, %v5486_v24, %v1113_v5  ;;  %v881_v54 = vadd.f32 %v802_v19, %v636_v31  ;;  %v5487_v48 = vrot.slane %v3863_v35, 2  ;;  %v5488_v9 = vrot.slane %v3879_v49, 1  ;;  %v4016_v5 = vld [vmem:[%s3235_s15 + $0x78] sm:$0xff] }
  0x8c   : > { %v1489_v61 = vadd.f32 %v1457_v57, %v1421_v52  ;;  %v1913_v0 = vrot.slane %v1796_v59, 2  ;;  %v415_v46 = vmul.f32 %v3239_v12, %v3545_v56  ;;  %v3984_v41 = vmul.f32 %v3239_v12, %v3557_v22  ;;  %2940 = vmatprep.mubr.msk.f32.mxu1 %vm2118_vm2, %v2102_v36  ;;  %v4024_v52 = vld [vmem:[%s3235_s15 + $0x80] sm:$0xff] }
  0x8d   : > { %v1358_v25 = vsel %vm747_vm1, %v5487_v48, %v1357_v32  ;;  %v1670_v58 = vsel %vm502_vm0, %v5488_v9, %v1669_v6  ;;  %v949_v29 = vadd.f32 %v917_v8, %v881_v54  ;;  %v660_v35 = vmul.f32 %v3241_v13, %v3545_v56 }
  0x8e   : > { %v3991_v49 = vmul.f32 %v3241_v13, %v3557_v22  ;;  %v902_v57 = vmul.f32 %v3247_v16, %v3782_v10  ;;  %v1733_v27 = vadd.f32 %v1630_v63, %v1489_v61  ;;  %v1914_v7 = vsel %vm747_vm1, %v1911_v14, %v1913_v0 }
  0x8f   : > { %v518_v42 = vrot.slane %v415_v46, 1  ;;  %v519_v53 = vrot.slane %v3984_v41, 1  ;;  %v1193_v8 = vadd.f32 %v1114_v50, %v949_v29  ;;  %v763_v28 = vrot.slane %v660_v35, 2 }
  0x90   : > { %v764_v56 = vrot.slane %v3991_v49, 2  ;;  %v973_v38 = vmul.f32 %v3249_v17, %v3782_v10  ;;  %v1977_v37 = vadd.f32 %v1874_v43, %v1733_v27  ;;  %v4007_v33 = vmul.f32 %v3249_v17, %v3790_v47 }
  0x91   : > { %v520_v63 = vsel %vm502_vm0, %v518_v42, %v519_v53  ;;  %v1217_v14 = vmul.f32 %v3251_v18, %v3782_v10  ;;  %v1437_v15 = vadd.f32 %v1358_v25, %v1193_v8  ;;  %v4021_v31 = vmul.f32 %v3251_v18, %v3790_v47 }
  0x92   : > { %v621_v2 = vadd.f32 %v520_v63, %v344_v4  ;;  %v765_v26 = vsel %vm747_vm1, %v763_v28, %v764_v56  ;;  %v1075_v19 = vrot.slane %v973_v38, 1  ;;  %v2016_v43 = vmul.f32 %v3405_v1, %v1977_v37 }
  0x93   : > { %v1076_v23 = vrot.slane %v4007_v33, 1  ;;  %v1319_v32 = vrot.slane %v1217_v14, 2  ;;  %v1505_v6 = vadd.f32 %v1473_v3, %v1437_v15  ;;  %v1458_v50 = vmul.f32 %v3293_v40, %v4016_v5 }
  0x94   : > { %v866_v24 = vadd.f32 %v765_v26, %v621_v2  ;;  %v1529_v59 = vmul.f32 %v3302_v45, %v4016_v5  ;;  %v2055_v4 = vadd.f32 %v3421_v21, %v2016_v43  ;;  %v1320_v54 = vrot.slane %v4021_v31, 2 }
  0x95   : > { %v1077_v36 = vsel %vm502_vm0, %v1075_v19, %v1076_v23  ;;  %v4037_v3 = vmul.f32 %v3302_v45, %v4024_v52  ;;  %v1749_v48 = vadd.f32 %v1670_v58, %v1505_v6  ;;  %v1773_v61 = vmul.f32 %v3316_v51, %v4016_v5 }
  0x96   : > { %v934_v25 = vadd.f32 %v902_v57, %v866_v24  ;;  %v1631_v9 = vrot.slane %v1529_v59, 1  ;;  %v2087_v0 = vmax.f32 %v2055_v4, 0.0  ;;  %v1321_v46 = vsel %vm747_vm1, %v1319_v32, %v1320_v54 }
  0x97   : > { %v1632_v29 = vrot.slane %v4037_v3, 1  ;;  %v4047_v35 = vmul.f32 %v3316_v51, %v4024_v52  ;;  %v1993_v27 = vadd.f32 %v1914_v7, %v1749_v48  ;;  %v1875_v8 = vrot.slane %v1773_v61, 2  ;;  %v4190_v3 = vld [vmem:[%s5448_s2] ss:$0 sm:$0xff] }
  0x98   : > { %v1178_v42 = vadd.f32 %v1077_v36, %v934_v25  ;;  %v360_v58 = vmul.f32 %v3237_v11, %v3624_v34  ;;  %2917 = vmatmul.mubr.msk.f32.gmra.mxu0 %vm2118_vm2, %v2087_v0  ;;  %v439_v38 = vmul.f32 %v3239_v12, %v3624_v34  ;;  %v4060_v37 = vmul.f32 %v3239_v12, %v3633_v55  ;;  %v4092_v0 = vld [vmem:[%s3235_s15 + $0x138] sm:$0xff] }
  0x99   : > { %v1633_v57 = vsel %vm502_vm0, %v1631_v9, %v1632_v29  ;;  %v1876_v28 = vrot.slane %v4047_v35, 2  ;;  %v2032_v7 = vmul.f32 %v3405_v1, %v1993_v27  ;;  %v684_v14 = vmul.f32 %v3241_v13, %v3624_v34 }
  0x9a   : > { %v1422_v63 = vadd.f32 %v1321_v46, %v1178_v42  ;;  %v4067_v15 = vmul.f32 %v3241_v13, %v3633_v55  ;;  %v558_v26 = vrot.slane %v439_v38, 1  ;;  %v559_v19 = vrot.slane %v4060_v37, 1 }
  0x9b   : > { %v1877_v2 = vsel %vm747_vm1, %v1875_v8, %v1876_v28  ;;  %v918_v43 = vmul.f32 %v3247_v16, %v3858_v39  ;;  %v2071_v32 = vadd.f32 %v3421_v21, %v2032_v7  ;;  %v803_v24 = vrot.slane %v684_v14, 2  ;;  %v4101_v7 = vld [vmem:[%s3235_s15 + $0x140] sm:$0xff] }
  0x9c   : > { %v1490_v6 = vadd.f32 %v1458_v50, %v1422_v63  ;;  %v804_v34 = vrot.slane %v4067_v15, 2  ;;  %v560_v59 = vsel %vm502_vm0, %v558_v26, %v559_v19  ;;  %v997_v4 = vmul.f32 %v3249_v17, %v3858_v39 }
  0x9d   : > { %v4084_v36 = vmul.f32 %v3249_v17, %v3867_v62  ;;  %v1241_v48 = vmul.f32 %v3251_v18, %v3858_v39  ;;  %v2103_v25 = vmax.f32 %v2071_v32, 0.0  ;;  %v637_v9 = vadd.f32 %v560_v59, %v360_v58 }
  0x9e   : > { %v1734_v50 = vadd.f32 %v1633_v57, %v1490_v6  ;;  %v805_v61 = vsel %vm747_vm1, %v803_v24, %v804_v34  ;;  %v1115_v46 = vrot.slane %v997_v4, 1  ;;  %v4097_v42 = vmul.f32 %v3251_v18, %v3867_v62 }
  0x9f   : > { %v1116_v27 = vrot.slane %v4084_v36, 1  ;;  %v1359_v8 = vrot.slane %v1241_v48, 2  ;;  %2941 = vmatmul.mubr.msk.f32.gmra.mxu1 %vm2118_vm2, %v2103_v25  ;;  %v882_v58 = vadd.f32 %v805_v61, %v637_v9  ;;  %v1474_v57 = vmul.f32 %v3293_v40, %v4092_v0 }
  0xa0   : > { %v1978_v38 = vadd.f32 %v1877_v2, %v1734_v50  ;;  %v1553_v63 = vmul.f32 %v3302_v45, %v4092_v0  ;;  %v5465_v26 = vrot.slane %v4097_v42, 2  ;;  %v4113_v32 = vmul.f32 %v3302_v45, %v4101_v7 }
  0xa1   : > { %v1117_v14 = vsel %vm502_vm0, %v1115_v46, %v1116_v27  ;;  %v1797_v2 = vmul.f32 %v3316_v51, %v4092_v0  ;;  %v950_v24 = vadd.f32 %v918_v43, %v882_v58  ;;  %v4120_v4 = vmul.f32 %v3316_v51, %v4101_v7 }
  0xa2   : > { %v2017_v6 = vmul.f32 %v3405_v1, %v1978_v38  ;;  %v1671_v59 = vrot.slane %v1553_v63, 1  ;;  %v1361_v48 = vsel %vm747_vm1, %v1359_v8, %v5465_v26  ;;  %v5464_v25 = vrot.slane %v4113_v32, 1 }
  0xa3   : > { %v1915_v50 = vrot.slane %v1797_v2, 2  ;;  %v345_v9 = vmul.f32 %v3237_v11, %v3557_v22  ;;  %v1194_v1 = vadd.f32 %v1117_v14, %v950_v24  ;;  %v1916_v43 = vrot.slane %v4120_v4, 2 }
  0xa4   : > { %v2056_v61 = vadd.f32 %v3421_v21, %v2017_v6  ;;  %v417_v46 = vmul.f32 %v3239_v12, %v3677_v20  ;;  %v1673_v38 = vsel %vm502_vm0, %v1671_v59, %v5464_v25  ;;  %v662_v8 = vmul.f32 %v3241_v13, %v3677_v20  ;;  %v4145_v6 = vld [vmem:[%s3235_s15 + $0x88] sm:$0x3] }
  0xa5   : > { %v903_v58 = vmul.f32 %v3247_v16, %v3790_v47  ;;  %v975_v22 = vmul.f32 %v3249_v17, %v3911_v60  ;;  %v1438_v63 = vadd.f32 %v1361_v48, %v1194_v1  ;;  %v1917_v14 = vsel %vm747_vm1, %v1915_v50, %v1916_v43 }
  0xa6   : > { %v2088_v21 = vmax.f32 %v2056_v61, 0.0  ;;  %v521_v2 = vrot.slane %v417_v46, 1  ;;  %v766_v24 = vrot.slane %v662_v8, 2  ;;  %v1219_v20 = vmul.f32 %v3251_v18, %v3911_v60 }
  0xa7   : > { %v1078_v59 = vrot.slane %v975_v22, 1  ;;  %v1459_v25 = vmul.f32 %v3293_v40, %v4024_v52  ;;  %v1506_v26 = vadd.f32 %v1474_v57, %v1438_v63  ;;  %v1531_v50 = vmul.f32 %v3302_v45, %v4145_v6 }
  0xa8   : > { %2919 = vmatprep.mubr.msk.f32.mxu0 %vm2118_vm2, %v2088_v21  ;;  %v522_v48 = vsel %vm502_vm0, %v519_v53, %v521_v2  ;;  %v1775_v61 = vmul.f32 %v3316_v51, %v4145_v6  ;;  %v767_v46 = vsel %vm747_vm1, %v764_v56, %v766_v24  ;;  %v1322_v8 = vrot.slane %v1219_v20, 2 }
  0xa9   : > { %v622_v1 = vadd.f32 %v522_v48, %v345_v9  ;;  %v1079_v57 = vsel %vm502_vm0, %v1076_v23, %v1078_v59  ;;  %v1750_v41 = vadd.f32 %v1673_v38, %v1506_v26  ;;  %v1634_v22 = vrot.slane %v1531_v50, 1  ;;  %v4208_v48 = vld [vmem:[%s5449_s3] ss:$0 sm:$0xff] }
  0xaa   : > { %v1878_v53 = vrot.slane %v1775_v61, 2  ;;  %v361_v21 = vmul.f32 %v3237_v11, %v3633_v55  ;;  %v1323_v9 = vsel %vm747_vm1, %v1320_v54, %v1322_v8  ;;  %v441_v49 = vmul.f32 %v3239_v12, %v3715_v30  ;;  %v4183_v54 = vld [vmem:[%s3235_s15 + $0x148] sm:$0x3] }
  0xab   : > { %v867_v63 = vadd.f32 %v767_v46, %v622_v1  ;;  %v686_v56 = vmul.f32 %v3241_v13, %v3715_v30  ;;  %v1994_v33 = vadd.f32 %v1917_v14, %v1750_v41  ;;  %v1635_v23 = vsel %vm502_vm0, %v1632_v29, %v1634_v22 }
  0xac   : > { %v1879_v55 = vsel %vm747_vm1, %v1876_v28, %v1878_v53  ;;  %v919_v31 = vmul.f32 %v3247_v16, %v3867_v62  ;;  %v561_v38 = vrot.slane %v441_v49, 1  ;;  %v999_v30 = vmul.f32 %v3249_v17, %v3949_v44 }
  0xad   : > { %v935_v26 = vadd.f32 %v903_v58, %v867_v63  ;;  %v806_v2 = vrot.slane %v686_v56, 2  ;;  %v2033_v29 = vmul.f32 %v4190_v3, %v1994_v33  ;;  %v1243_v35 = vmul.f32 %v3251_v18, %v3949_v44 }
  0xae   : > { %v1475_v28 = vmul.f32 %v3293_v40, %v4101_v7  ;;  %v1555_v58 = vmul.f32 %v3302_v45, %v4183_v54  ;;  %v562_v24 = vsel %vm502_vm0, %v559_v19, %v561_v38  ;;  %v1118_v20 = vrot.slane %v999_v30, 1 }
  0xaf   : > { %v1179_v14 = vadd.f32 %v1079_v57, %v935_v26  ;;  %v807_v59 = vsel %vm747_vm1, %v804_v34, %v806_v2  ;;  %v2072_v50 = vadd.f32 %v4208_v48, %v2033_v29  ;;  %v638_v61 = vadd.f32 %v562_v24, %v361_v21 }
  0xb0   : > { %v1362_v1 = vrot.slane %v1243_v35, 2  ;;  %v1674_v46 = vrot.slane %v1555_v58, 1  ;;  %v1119_v37 = vsel %vm502_vm0, %v1116_v27, %v1118_v20  ;;  %v1799_v15 = vmul.f32 %v3316_v51, %v4183_v54 }
  0xb1   : > { %v1423_v57 = vadd.f32 %v1323_v9, %v1179_v14  ;;  %v346_v19 = vmul.f32 %v3237_v11, %v3782_v10  ;;  %v2104_v34 = vmax.f32 %v2072_v50, 0.0  ;;  %v883_v8 = vadd.f32 %v807_v59, %v638_v61  ;;  %v4260_v59 = vld [vmem:[%s3235_s15 + $0x90] sm:$0xff] }
  0xb2   : > { %v5489_v41 = vrot.slane %v4097_v42, 2  ;;  %v5490_v53 = vrot.slane %v4113_v32, 1  ;;  %v1918_v36 = vrot.slane %v1799_v15, 2  ;;  %v418_v27 = vmul.f32 %v3239_v12, %v3782_v10 }
  0xb3   : > { %v1491_v63 = vadd.f32 %v1459_v25, %v1423_v57  ;;  %v4228_v9 = vmul.f32 %v3239_v12, %v3790_v47  ;;  %2943 = vmatprep.mubr.msk.f32.mxu1 %vm2118_vm2, %v2104_v34  ;;  %v951_v49 = vadd.f32 %v919_v31, %v883_v8  ;;  %v663_v42 = vmul.f32 %v3241_v13, %v3782_v10 }
  0xb4   : > { %v1363_v22 = vsel %vm747_vm1, %v5489_v41, %v1362_v1  ;;  %v1675_v21 = vsel %vm502_vm0, %v5490_v53, %v1674_v46  ;;  %v4235_v32 = vmul.f32 %v3241_v13, %v3790_v47  ;;  %v904_v25 = vmul.f32 %v3247_v16, %v4016_v5  ;;  %v4268_v46 = vld [vmem:[%s3235_s15 + $0x98] sm:$0xff] }
  0xb5   : > { %v1735_v56 = vadd.f32 %v1635_v23, %v1491_v63  ;;  %v1919_v33 = vsel %vm747_vm1, %v1916_v43, %v1918_v36  ;;  %v523_v26 = vrot.slane %v418_v27, 1  ;;  %v524_v38 = vrot.slane %v4228_v9, 1 }
  0xb6   : > { %v1195_v31 = vadd.f32 %v1119_v37, %v951_v49  ;;  %v768_v2 = vrot.slane %v663_v42, 2  ;;  %v769_v10 = vrot.slane %v4235_v32, 2  ;;  %v976_v30 = vmul.f32 %v3249_v17, %v4016_v5 }
  0xb7   : > { %v1979_v29 = vadd.f32 %v1879_v55, %v1735_v56  ;;  %v525_v23 = vsel %vm502_vm0, %v523_v26, %v524_v38  ;;  %v4251_v4 = vmul.f32 %v3249_v17, %v4024_v52  ;;  %v1220_v43 = vmul.f32 %v3251_v18, %v4016_v5 }
  0xb8   : > { %v1439_v35 = vadd.f32 %v1363_v22, %v1195_v31  ;;  %v623_v58 = vadd.f32 %v525_v23, %v346_v19  ;;  %v770_v14 = vsel %vm747_vm1, %v768_v2, %v769_v10  ;;  %v1080_v24 = vrot.slane %v976_v30, 1 }
  0xb9   : > { %v2018_v55 = vmul.f32 %v4190_v3, %v1979_v29  ;;  %v1081_v20 = vrot.slane %v4251_v4, 1  ;;  %v4265_v50 = vmul.f32 %v3251_v18, %v4024_v52  ;;  %v1324_v61 = vrot.slane %v1220_v43, 2 }
  0xba   : > { %v1507_v1 = vadd.f32 %v1475_v28, %v1439_v35  ;;  %v868_v57 = vadd.f32 %v770_v14, %v623_v58  ;;  %v1460_v37 = vmul.f32 %v3293_v40, %v4260_v59  ;;  %v1532_v15 = vmul.f32 %v3302_v45, %v4260_v59 }
  0xbb   : > { %v2057_v19 = vadd.f32 %v4208_v48, %v2018_v55  ;;  %v1082_v34 = vsel %vm502_vm0, %v1080_v24, %v1081_v20  ;;  %v1325_v8 = vrot.slane %v4265_v50, 2  ;;  %v4281_v28 = vmul.f32 %v3302_v45, %v4268_v46 }
  0xbc   : > { %v1751_v41 = vadd.f32 %v1675_v21, %v1507_v1  ;;  %v936_v22 = vadd.f32 %v904_v25, %v868_v57  ;;  %v1636_v53 = vrot.slane %v1532_v15, 1  ;;  %v1776_v63 = vmul.f32 %v3316_v51, %v4260_v59 }
  0xbd   : > { %v2089_v36 = vmax.f32 %v2057_v19, 0.0  ;;  %v1326_v27 = vsel %vm747_vm1, %v1324_v61, %v1325_v8  ;;  %v1637_v49 = vrot.slane %v4281_v28, 1  ;;  %v4291_v42 = vmul.f32 %v3316_v51, %v4268_v46 }
  0xbe   : > { %v1995_v56 = vadd.f32 %v1919_v33, %v1751_v41  ;;  %v1180_v26 = vadd.f32 %v1082_v34, %v936_v22  ;;  %v1880_v31 = vrot.slane %v1776_v63, 2  ;;  %v362_v21 = vmul.f32 %v3237_v11, %v3858_v39 }
  0xbf   : > { %2920 = vmatmul.mubr.msk.f32.gmra.mxu0 %vm2118_vm2, %v2089_v36  ;;  %v1638_v25 = vsel %vm502_vm0, %v1636_v53, %v1637_v49  ;;  %v1881_v2 = vrot.slane %v4291_v42, 2  ;;  %v442_v30 = vmul.f32 %v3239_v12, %v3858_v39  ;;  %v4304_v29 = vmul.f32 %v3239_v12, %v3867_v62  ;;  %v4336_v36 = vld [vmem:[%s3235_s15 + $0x150] sm:$0xff] }
  0xc0   : > { %v2034_v33 = vmul.f32 %v4190_v3, %v1995_v56  ;;  %v1424_v23 = vadd.f32 %v1326_v27, %v1180_v26  ;;  %v687_v43 = vmul.f32 %v3241_v13, %v3858_v39  ;;  %v4311_v35 = vmul.f32 %v3241_v13, %v3867_v62 }
  0xc1   : > { %v1882_v58 = vsel %vm747_vm1, %v1880_v31, %v1881_v2  ;;  %v563_v14 = vrot.slane %v442_v30, 1  ;;  %v564_v24 = vrot.slane %v4304_v29, 1  ;;  %v920_v55 = vmul.f32 %v3247_v16, %v4092_v0 }
  0xc2   : > { %v2073_v61 = vadd.f32 %v4208_v48, %v2034_v33  ;;  %v1492_v1 = vadd.f32 %v1460_v37, %v1424_v23  ;;  %v808_v57 = vrot.slane %v687_v43, 2  ;;  %v5469_v39 = vrot.slane %v4311_v35, 2  ;;  %v4345_v33 = vld [vmem:[%s3235_s15 + $0x158] sm:$0xff] }
  0xc3   : > { %v565_v15 = vsel %vm502_vm0, %v563_v14, %v564_v24  ;;  %v1000_v19 = vmul.f32 %v3249_v17, %v4092_v0  ;;  %v4328_v34 = vmul.f32 %v3249_v17, %v4101_v7  ;;  %v1244_v41 = vmul.f32 %v3251_v18, %v4092_v0 }
  0xc4   : > { %v2105_v22 = vmax.f32 %v2073_v61, 0.0  ;;  %v1736_v37 = vadd.f32 %v1638_v25, %v1492_v1  ;;  %v639_v53 = vadd.f32 %v565_v15, %v362_v21  ;;  %v810_v63 = vsel %vm747_vm1, %v808_v57, %v5469_v39 }
  0xc5   : > { %v1120_v27 = vrot.slane %v1000_v19, 1  ;;  %v5467_v56 = vrot.slane %v4328_v34, 1  ;;  %v4341_v26 = vmul.f32 %v3251_v18, %v4101_v7  ;;  %v1364_v31 = vrot.slane %v1244_v41, 2 }
  0xc6   : > { %2944 = vmatmul.mubr.msk.f32.gmra.mxu1 %vm2118_vm2, %v2105_v22  ;;  %v1980_v30 = vadd.f32 %v1882_v58, %v1736_v37  ;;  %v884_v21 = vadd.f32 %v810_v63, %v639_v53  ;;  %v1476_v25 = vmul.f32 %v3293_v40, %v4336_v36  ;;  %v1556_v23 = vmul.f32 %v3302_v45, %v4336_v36 }
  0xc7   : > { %v1122_v43 = vsel %vm502_vm0, %v1120_v27, %v5467_v56  ;;  %v5466_v14 = vrot.slane %v4341_v26, 2  ;;  %v4357_v61 = vmul.f32 %v3302_v45, %v4345_v33  ;;  %v1800_v58 = vmul.f32 %v3316_v51, %v4336_v36 }
  0xc8   : > { %v2019_v1 = vmul.f32 %v4190_v3, %v1980_v30  ;;  %v952_v57 = vadd.f32 %v920_v55, %v884_v21  ;;  %v1676_v15 = vrot.slane %v1556_v23, 1  ;;  %v4364_v19 = vmul.f32 %v3316_v51, %v4345_v33 }
  0xc9   : > { %v1366_v41 = vsel %vm747_vm1, %v1364_v31, %v5466_v14  ;;  %v5468_v22 = vrot.slane %v4357_v61, 1  ;;  %v1920_v37 = vrot.slane %v1800_v58, 2  ;;  %v347_v53 = vmul.f32 %v3237_v11, %v3790_v47  ;;  %v4389_v14 = vld [vmem:[%s3235_s15 + $0xa0] sm:$0x3] }
  0xca   : > { %v2058_v63 = vadd.f32 %v4208_v48, %v2019_v1  ;;  %v1196_v27 = vadd.f32 %v1122_v43, %v952_v57  ;;  %v1921_v55 = vrot.slane %v4364_v19, 2  ;;  %v420_v30 = vmul.f32 %v3239_v12, %v3911_v60 }
  0xcb   : > { %v1678_v21 = vsel %vm502_vm0, %v1676_v15, %v5468_v22  ;;  %v665_v31 = vmul.f32 %v3241_v13, %v3911_v60  ;;  %v905_v23 = vmul.f32 %v3247_v16, %v4024_v52  ;;  %v978_v47 = vmul.f32 %v3249_v17, %v4145_v6 }
  0xcc   : > { %v2090_v58 = vmax.f32 %v2058_v63, 0.0  ;;  %v1440_v43 = vadd.f32 %v1366_v41, %v1196_v27  ;;  %v1922_v1 = vsel %vm747_vm1, %v1920_v37, %v1921_v55  ;;  %v526_v57 = vrot.slane %v420_v30, 1 }
  0xcd   : > { %v771_v56 = vrot.slane %v665_v31, 2  ;;  %v1083_v15 = vrot.slane %v978_v47, 1  ;;  %v1222_v60 = vmul.f32 %v3251_v18, %v4145_v6  ;;  %v1461_v22 = vmul.f32 %v3293_v40, %v4268_v46 }
  0xce   : > { %2922 = vmatprep.mubr.msk.f32.mxu0 %vm2118_vm2, %v2090_v58  ;;  %v1508_v39 = vadd.f32 %v1476_v25, %v1440_v43  ;;  %v527_v41 = vsel %vm502_vm0, %v524_v38, %v526_v57  ;;  %v1534_v37 = vmul.f32 %v3302_v45, %v4389_v14  ;;  %v1778_v63 = vmul.f32 %v3316_v51, %v4389_v14 }
  0xcf   : > { %v624_v27 = vadd.f32 %v527_v41, %v347_v53  ;;  %v772_v30 = vsel %vm747_vm1, %v769_v10, %v771_v56  ;;  %v1084_v25 = vsel %vm502_vm0, %v1081_v20, %v1083_v15  ;;  %v1327_v31 = vrot.slane %v1222_v60, 2 }
  0xd0   : > { %v1752_v9 = vadd.f32 %v1678_v21, %v1508_v39  ;;  %v1639_v47 = vrot.slane %v1534_v37, 1  ;;  %v1883_v38 = vrot.slane %v1778_v63, 2  ;;  %v363_v58 = vmul.f32 %v3237_v11, %v3867_v62 }
  0xd1   : > { %v869_v43 = vadd.f32 %v772_v30, %v624_v27  ;;  %v1328_v53 = vsel %vm747_vm1, %v1325_v8, %v1327_v31  ;;  %v444_v32 = vmul.f32 %v3239_v12, %v3949_v44  ;;  %v689_v10 = vmul.f32 %v3241_v13, %v3949_v44  ;;  %v4427_v8 = vld [vmem:[%s3235_s15 + $0x160] sm:$0x3] }
  0xd2   : > { %v1996_v4 = vadd.f32 %v1922_v1, %v1752_v9  ;;  %v1640_v20 = vsel %vm502_vm0, %v1637_v49, %v1639_v47  ;;  %v1884_v62 = vsel %vm747_vm1, %v1881_v2, %v1883_v38  ;;  %v921_v50 = vmul.f32 %v3247_v16, %v4101_v7 }
  0xd3   : > { %v937_v39 = vadd.f32 %v905_v23, %v869_v43  ;;  %v566_v56 = vrot.slane %v444_v32, 1  ;;  %v811_v21 = vrot.slane %v689_v10, 2  ;;  %v1002_v44 = vmul.f32 %v3249_v17, %v4183_v54 }
  0xd4   : > { %v2035_v1 = vmul.f32 %v4190_v3, %v1996_v4  ;;  %v1246_v28 = vmul.f32 %v3251_v18, %v4183_v54  ;;  %v1477_v49 = vmul.f32 %v3293_v40, %v4345_v33  ;;  %v1558_v42 = vmul.f32 %v3302_v45, %v4427_v8 }
  0xd5   : > { %v1181_v2 = vadd.f32 %v1084_v25, %v937_v39  ;;  %v567_v23 = vsel %vm502_vm0, %v564_v24, %v566_v56  ;;  %v5491_v57 = vrot.slane %v4311_v35, 2  ;;  %v1123_v60 = vrot.slane %v1002_v44, 1 }
  0xd6   : > { %v2074_v41 = vadd.f32 %v4208_v48, %v2035_v1  ;;  %v640_v37 = vadd.f32 %v567_v23, %v363_v58  ;;  %v1367_v63 = vrot.slane %v1246_v28, 2  ;;  %v1679_v27 = vrot.slane %v1558_v42, 1 }
  0xd7   : > { %v812_v15 = vsel %vm747_vm1, %v5491_v57, %v811_v21  ;;  %v1425_v30 = vadd.f32 %v1328_v53, %v1181_v2  ;;  %v5492_v31 = vrot.slane %v4328_v34, 1  ;;  %v1802_v29 = vmul.f32 %v3316_v51, %v4427_v8 }
  0xd8   : > { %v348_v24 = vmul.f32 %v3237_v11, %v4016_v5  ;;  %v2106_v35 = vmax.f32 %v2074_v41, 0.0  ;;  %v885_v25 = vadd.f32 %v812_v15, %v640_v37  ;;  %v5493_v47 = vrot.slane %v4341_v26, 2 }
  0xd9   : > { %v1124_v9 = vsel %vm502_vm0, %v5492_v31, %v1123_v60  ;;  %v5494_v58 = vrot.slane %v4357_v61, 1  ;;  %v1493_v53 = vadd.f32 %v1461_v22, %v1425_v30  ;;  %v1923_v34 = vrot.slane %v1802_v29, 2  ;;  %v4494_v60 = vld [vmem:[%s3235_s15 + $0xa8] sm:$0xff]  ;;  %v4502_v30 = vld [vmem:[%s3235_s15 + $0xb0] sm:$0xff] }
  0xda   : > { %v1368_v38 = vsel %vm747_vm1, %v5493_v47, %v1367_v63  ;;  %v421_v32 = vmul.f32 %v3239_v12, %v4016_v5  ;;  %v4462_v10 = vmul.f32 %v3239_v12, %v4024_v52  ;;  %2946 = vmatprep.mubr.msk.f32.mxu1 %vm2118_vm2, %v2106_v35  ;;  %v953_v4 = vadd.f32 %v921_v50, %v885_v25 }
  0xdb   : > { %v1680_v43 = vsel %vm502_vm0, %v5494_v58, %v1679_v27  ;;  %v666_v26 = vmul.f32 %v3241_v13, %v4016_v5  ;;  %v4469_v61 = vmul.f32 %v3241_v13, %v4024_v52  ;;  %v906_v22 = vmul.f32 %v3247_v16, %v4260_v59 }
  0xdc   : > { %v1737_v39 = vadd.f32 %v1640_v20, %v1493_v53  ;;  %v1924_v56 = vsel %vm747_vm1, %v1921_v55, %v1923_v34  ;;  %v528_v21 = vrot.slane %v421_v32, 1  ;;  %v529_v44 = vrot.slane %v4462_v10, 1 }
  0xdd   : > { %v1197_v50 = vadd.f32 %v1124_v9, %v953_v4  ;;  %v773_v1 = vrot.slane %v666_v26, 2  ;;  %v774_v5 = vrot.slane %v4469_v61, 2  ;;  %v979_v28 = vmul.f32 %v3249_v17, %v4260_v59 }
  0xde   : > { %v1981_v42 = vadd.f32 %v1884_v62, %v1737_v39  ;;  %v530_v20 = vsel %vm502_vm0, %v528_v21, %v529_v44  ;;  %v4485_v19 = vmul.f32 %v3249_v17, %v4268_v46  ;;  %v1223_v55 = vmul.f32 %v3251_v18, %v4260_v59 }
  0xdf   : > { %v1441_v2 = vadd.f32 %v1368_v38, %v1197_v50  ;;  %v625_v23 = vadd.f32 %v530_v20, %v348_v24  ;;  %v775_v57 = vsel %vm747_vm1, %v773_v1, %v774_v5  ;;  %v1085_v15 = vrot.slane %v979_v28, 1 }
  0xe0   : > { %v2020_v62 = vmul.f32 %v4190_v3, %v1981_v42  ;;  %v1086_v41 = vrot.slane %v4485_v19, 1  ;;  %v4499_v37 = vmul.f32 %v3251_v18, %v4268_v46  ;;  %v1329_v63 = vrot.slane %v1223_v55, 2 }
  0xe1   : > { %v1509_v27 = vadd.f32 %v1477_v49, %v1441_v2  ;;  %v870_v31 = vadd.f32 %v775_v57, %v625_v23  ;;  %v1462_v9 = vmul.f32 %v3293_v40, %v4494_v60  ;;  %v1535_v29 = vmul.f32 %v3302_v45, %v4494_v60 }
  0xe2   : > { %v2059_v24 = vadd.f32 %v4208_v48, %v2020_v62  ;;  %v1087_v35 = vsel %vm502_vm0, %v1085_v15, %v1086_v41  ;;  %v1330_v25 = vrot.slane %v4499_v37, 2  ;;  %v4515_v49 = vmul.f32 %v3302_v45, %v4502_v30 }
  0xe3   : > { %v1753_v47 = vadd.f32 %v1680_v43, %v1509_v27  ;;  %v938_v38 = vadd.f32 %v906_v22, %v870_v31  ;;  %v1641_v58 = vrot.slane %v1535_v29, 1  ;;  %v1779_v53 = vmul.f32 %v3316_v51, %v4494_v60 }
  0xe4   : > { %v2091_v34 = vmax.f32 %v2059_v24, 0.0  ;;  %v1331_v32 = vsel %vm747_vm1, %v1329_v63, %v1330_v25  ;;  %v1642_v4 = vrot.slane %v4515_v49, 1  ;;  %v4525_v26 = vmul.f32 %v3316_v51, %v4502_v30 }
  0xe5   : > { %v1997_v39 = vadd.f32 %v1924_v56, %v1753_v47  ;;  %v1182_v21 = vadd.f32 %v1087_v35, %v938_v38  ;;  %v1885_v50 = vrot.slane %v1779_v53, 2  ;;  %v364_v43 = vmul.f32 %v3237_v11, %v4092_v0 }
  0xe6   : > { %2923 = vmatmul.mubr.msk.f32.gmra.mxu0 %vm2118_vm2, %v2091_v34  ;;  %v1643_v22 = vsel %vm502_vm0, %v1641_v58, %v1642_v4  ;;  %v1886_v1 = vrot.slane %v4525_v26, 2  ;;  %v445_v28 = vmul.f32 %v3239_v12, %v4092_v0  ;;  %v4538_v42 = vmul.f32 %v3239_v12, %v4101_v7  ;;  %v4570_v34 = vld [vmem:[%s3235_s15 + $0x168] sm:$0xff] }
  0xe7   : > { %v2036_v56 = vmul.f32 %v4190_v3, %v1997_v39  ;;  %v1426_v20 = vadd.f32 %v1331_v32, %v1182_v21  ;;  %v690_v55 = vmul.f32 %v3241_v13, %v4092_v0  ;;  %v4545_v2 = vmul.f32 %v3241_v13, %v4101_v7 }
  0xe8   : > { %v1887_v23 = vsel %vm747_vm1, %v1885_v50, %v1886_v1  ;;  %v568_v57 = vrot.slane %v445_v28, 1  ;;  %v569_v15 = vrot.slane %v4538_v42, 1  ;;  %v922_v62 = vmul.f32 %v3247_v16, %v4336_v36 }
  0xe9   : > { %v2075_v63 = vadd.f32 %v4208_v48, %v2036_v56  ;;  %v1494_v27 = vadd.f32 %v1462_v9, %v1426_v20  ;;  %v813_v31 = vrot.slane %v690_v55, 2  ;;  %v5473_v0 = vrot.slane %v4545_v2, 2  ;;  %v4579_v56 = vld [vmem:[%s3235_s15 + $0x170] sm:$0xff] }
  0xea   : > { %v570_v29 = vsel %vm502_vm0, %v568_v57, %v569_v15  ;;  %v1003_v24 = vmul.f32 %v3249_v17, %v4336_v36  ;;  %v4562_v35 = vmul.f32 %v3249_v17, %v4345_v33  ;;  %v1247_v47 = vmul.f32 %v3251_v18, %v4336_v36 }
  0xeb   : > { %v2107_v38 = vmax.f32 %v2075_v63, 0.0  ;;  %v1738_v9 = vadd.f32 %v1643_v22, %v1494_v27  ;;  %v641_v58 = vadd.f32 %v570_v29, %v364_v43  ;;  %v815_v53 = vsel %vm747_vm1, %v813_v31, %v5473_v0 }
  0xec   : > { %v1125_v32 = vrot.slane %v1003_v24, 1  ;;  %v5471_v39 = vrot.slane %v4562_v35, 1  ;;  %v4575_v21 = vmul.f32 %v3251_v18, %v4345_v33  ;;  %v1369_v50 = vrot.slane %v1247_v47, 2 }
  0xed   : > { %2947 = vmatmul.mubr.msk.f32.gmra.mxu1 %vm2118_vm2, %v2107_v38  ;;  %v1982_v28 = vadd.f32 %v1887_v23, %v1738_v9  ;;  %v886_v43 = vadd.f32 %v815_v53, %v641_v58  ;;  %v1478_v22 = vmul.f32 %v3293_v40, %v4570_v34  ;;  %v1559_v20 = vmul.f32 %v3302_v45, %v4570_v34 }
  0xee   : > { %v1127_v55 = vsel %vm502_vm0, %v1125_v32, %v5471_v39  ;;  %v5470_v57 = vrot.slane %v4575_v21, 2  ;;  %v4591_v63 = vmul.f32 %v3302_v45, %v4579_v56  ;;  %v1803_v23 = vmul.f32 %v3316_v51, %v4570_v34 }
  0xef   : > { %v2021_v27 = vmul.f32 %v4190_v3, %v1982_v28  ;;  %v954_v31 = vadd.f32 %v922_v62, %v886_v43  ;;  %v1681_v29 = vrot.slane %v1559_v20, 1  ;;  %v4598_v24 = vmul.f32 %v3316_v51, %v4579_v56 }
  0xf0   : > { %v1371_v47 = vsel %vm747_vm1, %v1369_v50, %v5470_v57  ;;  %v5472_v38 = vrot.slane %v4591_v63, 1  ;;  %v1925_v9 = vrot.slane %v1803_v23, 2  ;;  %v349_v58 = vmul.f32 %v3237_v11, %v4024_v52  ;;  %v4623_v57 = vld [vmem:[%s3235_s15 + $0xb8] sm:$0x3] }
  0xf1   : > { %v2060_v53 = vadd.f32 %v4208_v48, %v2021_v27  ;;  %v1198_v32 = vadd.f32 %v1127_v55, %v954_v31  ;;  %v1926_v62 = vrot.slane %v4598_v24, 2  ;;  %v423_v28 = vmul.f32 %v3239_v12, %v4145_v6 }
  0xf2   : > { %v1683_v43 = vsel %vm502_vm0, %v1681_v29, %v5472_v38  ;;  %v668_v50 = vmul.f32 %v3241_v13, %v4145_v6  ;;  %v907_v20 = vmul.f32 %v3247_v16, %v4268_v46  ;;  %v981_v52 = vmul.f32 %v3249_v17, %v4389_v14 }
  0xf3   : > { %v2092_v23 = vmax.f32 %v2060_v53, 0.0  ;;  %v1442_v55 = vadd.f32 %v1371_v47, %v1198_v32  ;;  %v1927_v27 = vsel %vm747_vm1, %v1925_v9, %v1926_v62  ;;  %v531_v31 = vrot.slane %v423_v28, 1 }
  0xf4   : > { %v776_v39 = vrot.slane %v668_v50, 2  ;;  %v1088_v29 = vrot.slane %v981_v52, 1  ;;  %v1225_v6 = vmul.f32 %v3251_v18, %v4389_v14  ;;  %v1463_v38 = vmul.f32 %v3293_v40, %v4502_v30 }
  0xf5   : > { %2925 = vmatprep.mubr.msk.f32.mxu0 %vm2118_vm2, %v2092_v23  ;;  %v1510_v0 = vadd.f32 %v1478_v22, %v1442_v55  ;;  %v532_v47 = vsel %vm502_vm0, %v529_v44, %v531_v31  ;;  %v1537_v9 = vmul.f32 %v3302_v45, %v4623_v57  ;;  %v1781_v53 = vmul.f32 %v3316_v51, %v4623_v57 }
  0xf6   : > { %v626_v32 = vadd.f32 %v532_v47, %v349_v58  ;;  %v777_v28 = vsel %vm747_vm1, %v774_v5, %v776_v39  ;;  %v1089_v22 = vsel %vm502_vm0, %v1086_v41, %v1088_v29  ;;  %v1332_v50 = vrot.slane %v1225_v6, 2 }
  0xf7   : > { %v1754_v10 = vadd.f32 %v1683_v43, %v1510_v0  ;;  %v1644_v52 = vrot.slane %v1537_v9, 1  ;;  %v1888_v44 = vrot.slane %v1781_v53, 2  ;;  %v365_v23 = vmul.f32 %v3237_v11, %v4101_v7 }
  0xf8   : > { %v871_v55 = vadd.f32 %v777_v28, %v626_v32  ;;  %v1333_v58 = vsel %vm747_vm1, %v1330_v25, %v1332_v50  ;;  %v447_v61 = vmul.f32 %v3239_v12, %v4183_v54  ;;  %v692_v5 = vmul.f32 %v3241_v13, %v4183_v54  ;;  %v4661_v25 = vld [vmem:[%s3235_s15 + $0x178] sm:$0x3] }
  0xf9   : > { %v1998_v19 = vadd.f32 %v1927_v27, %v1754_v10  ;;  %v1645_v41 = vsel %vm502_vm0, %v1642_v4, %v1644_v52  ;;  %v1889_v7 = vsel %vm747_vm1, %v1886_v1, %v1888_v44  ;;  %v923_v37 = vmul.f32 %v3247_v16, %v4345_v33 }
  0xfa   : > { %v939_v0 = vadd.f32 %v907_v20, %v871_v55  ;;  %v571_v39 = vrot.slane %v447_v61, 1  ;;  %v816_v43 = vrot.slane %v692_v5, 2  ;;  %v1005_v54 = vmul.f32 %v3249_v17, %v4427_v8 }
  0xfb   : > { %v2037_v27 = vmul.f32 %v4190_v3, %v1998_v19  ;;  %v1249_v49 = vmul.f32 %v3251_v18, %v4427_v8  ;;  %v1479_v4 = vmul.f32 %v3293_v40, %v4579_v56  ;;  %v1561_v26 = vmul.f32 %v3302_v45, %v4661_v25 }
  0xfc   : > { %v1183_v1 = vadd.f32 %v1089_v22, %v939_v0  ;;  %v572_v20 = vsel %vm502_vm0, %v569_v15, %v571_v39  ;;  %v5495_v31 = vrot.slane %v4545_v2, 2  ;;  %v1128_v6 = vrot.slane %v1005_v54, 1 }
  0xfd   : > { %v2076_v47 = vadd.f32 %v4208_v48, %v2037_v27  ;;  %v642_v9 = vadd.f32 %v572_v20, %v365_v23  ;;  %v1372_v53 = vrot.slane %v1249_v49, 2  ;;  %v1684_v32 = vrot.slane %v1561_v26, 1 }
  0xfe   : > { %v817_v29 = vsel %vm747_vm1, %v5495_v31, %v816_v43  ;;  %v1427_v28 = vadd.f32 %v1333_v58, %v1183_v1  ;;  %v5496_v50 = vrot.slane %v4562_v35, 1  ;;  %v1805_v42 = vmul.f32 %v3316_v51, %v4661_v25 }
  0xff   : > { %v350_v15 = vmul.f32 %v3237_v11, %v4260_v59  ;;  %v2108_v2 = vmax.f32 %v2076_v47, 0.0  ;;  %v887_v22 = vadd.f32 %v817_v29, %v642_v9  ;;  %v5497_v52 = vrot.slane %v4575_v21, 2 }
 0x100   : > { %v1129_v10 = vsel %vm502_vm0, %v5496_v50, %v1128_v6  ;;  %v5498_v23 = vrot.slane %v4591_v63, 1  ;;  %v1495_v58 = vadd.f32 %v1463_v38, %v1427_v28  ;;  %v1928_v35 = vrot.slane %v1805_v42, 2  ;;  %v4733_v28 = vld [vmem:[%s3235_s15 + $0xc0] sm:$0xff] }
 0x101   : > { %v1373_v44 = vsel %vm747_vm1, %v5497_v52, %v1372_v53  ;;  %v424_v61 = vmul.f32 %v3239_v12, %v4260_v59  ;;  %v4696_v5 = vmul.f32 %v3239_v12, %v4268_v46  ;;  %2949 = vmatprep.mubr.msk.f32.mxu1 %vm2118_vm2, %v2108_v2  ;;  %v955_v19 = vadd.f32 %v923_v37, %v887_v22  ;;  %v4745_v22 = vld [vmem:[%s3235_s15 + $0xc8] sm:$0xff] }
 0x102   : > { %v1685_v55 = vsel %vm502_vm0, %v5498_v23, %v1684_v32  ;;  %v669_v21 = vmul.f32 %v3241_v13, %v4260_v59  ;;  %v4703_v63 = vmul.f32 %v3241_v13, %v4268_v46  ;;  %v908_v38 = vmul.f32 %v3247_v16, %v4494_v60 }
 0x103   : > { %v1739_v0 = vadd.f32 %v1645_v41, %v1495_v58  ;;  %v1929_v39 = vsel %vm747_vm1, %v1926_v62, %v1928_v35  ;;  %v533_v43 = vrot.slane %v424_v61, 1  ;;  %v534_v54 = vrot.slane %v4696_v5, 1 }
 0x104   : > { %v1199_v27 = vadd.f32 %v1129_v10, %v955_v19  ;;  %v778_v37 = vrot.slane %v669_v21, 2  ;;  %v779_v49 = vrot.slane %v4703_v63, 2  ;;  %v982_v59 = vmul.f32 %v3249_v17, %v4494_v60 }
 0x105   : > { %v1983_v26 = vadd.f32 %v1889_v7, %v1739_v0  ;;  %v535_v41 = vsel %vm502_vm0, %v533_v43, %v534_v54  ;;  %v4719_v24 = vmul.f32 %v3249_v17, %v4502_v30  ;;  %v1226_v62 = vmul.f32 %v3251_v18, %v4494_v60 }
 0x106   : > { %v1443_v1 = vadd.f32 %v1373_v44, %v1199_v27  ;;  %v627_v20 = vadd.f32 %v535_v41, %v350_v15  ;;  %v780_v31 = vsel %vm747_vm1, %v778_v37, %v779_v49  ;;  %v1090_v29 = vrot.slane %v982_v59, 1 }
 0x107   : > { %v2022_v7 = vmul.f32 %v4190_v3, %v1983_v26  ;;  %v1091_v6 = vrot.slane %v4719_v24, 1  ;;  %v4730_v47 = vmul.f32 %v3251_v18, %v4502_v30  ;;  %v1334_v9 = vrot.slane %v1226_v62, 2 }
 0x108   : > { %v1511_v53 = vadd.f32 %v1479_v4, %v1443_v1  ;;  %v872_v32 = vadd.f32 %v780_v31, %v627_v20  ;;  %v1464_v50 = vmul.f32 %v4733_v28, %v3293_v40  ;;  %v1538_v10 = vmul.f32 %v4733_v28, %v3302_v45 }
 0x109   : > { %v2061_v42 = vadd.f32 %v4208_v48, %v2022_v7  ;;  %v1092_v15 = vsel %vm502_vm0, %v1090_v29, %v1091_v6  ;;  %v1335_v2 = vrot.slane %v4730_v47, 2  ;;  %v4749_v4 = vmul.f32 %v4745_v22, %v3302_v45 }
 0x10a   : > { %v1755_v52 = vadd.f32 %v1685_v55, %v1511_v53  ;;  %v940_v44 = vadd.f32 %v908_v38, %v872_v32  ;;  %v1646_v23 = vrot.slane %v1538_v10, 1  ;;  %v1782_v58 = vmul.f32 %v4733_v28, %v3316_v51 }
 0x10b   : > { %v2093_v35 = vmax.f32 %v2061_v42, 0.0  ;;  %v1336_v61 = vsel %vm747_vm1, %v1334_v9, %v1335_v2  ;;  %v1647_v19 = vrot.slane %v4749_v4, 1  ;;  %v4759_v21 = vmul.f32 %v4745_v22, %v3316_v51 }
 0x10c   : > { %v1999_v0 = vadd.f32 %v1929_v39, %v1755_v52  ;;  %v1184_v43 = vadd.f32 %v1092_v15, %v940_v44  ;;  %v1890_v27 = vrot.slane %v1782_v58, 2  ;;  %v366_v55 = vmul.f32 %v3237_v11, %v4336_v36 }
 0x10d   : > { %2926 = vmatmul.mubr.msk.f32.gmra.mxu0 %vm2118_vm2, %v2093_v35  ;;  %v1648_v38 = vsel %vm502_vm0, %v1646_v23, %v1647_v19  ;;  %v1891_v37 = vrot.slane %v4759_v21, 2  ;;  %v448_v59 = vmul.f32 %v3239_v12, %v4336_v36  ;;  %v4772_v26 = vmul.f32 %v3239_v12, %v4345_v33  ;;  %v4804_v35 = vld [vmem:[%s3235_s15 + $0x180] sm:$0xff] }
 0x10e   : > { %v2038_v39 = vmul.f32 %v4190_v3, %v1999_v0  ;;  %v1428_v41 = vadd.f32 %v1336_v61, %v1184_v43  ;;  %v693_v62 = vmul.f32 %v3241_v13, %v4336_v36  ;;  %v4779_v1 = vmul.f32 %v3241_v13, %v4345_v33 }
 0x10f   : > { %v1892_v20 = vsel %vm747_vm1, %v1890_v27, %v1891_v37  ;;  %v573_v31 = vrot.slane %v448_v59, 1  ;;  %v574_v29 = vrot.slane %v4772_v26, 1  ;;  %v924_v7 = vmul.f32 %v3247_v16, %v4570_v34 }
 0x110   : > { %v2077_v9 = vadd.f32 %v4208_v48, %v2038_v39  ;;  %v1496_v53 = vadd.f32 %v1464_v50, %v1428_v41  ;;  %v818_v32 = vrot.slane %v693_v62, 2  ;;  %v819_v36 = vrot.slane %v4779_v1, 2  ;;  %v4813_v39 = vld [vmem:[%s3235_s15 + $0x188] sm:$0xff] }
 0x111   : > { %v575_v10 = vsel %vm502_vm0, %v573_v31, %v574_v29  ;;  %v1006_v42 = vmul.f32 %v3249_v17, %v4570_v34  ;;  %v4796_v15 = vmul.f32 %v3249_v17, %v4579_v56  ;;  %v1250_v52 = vmul.f32 %v3251_v18, %v4570_v34 }
 0x112   : > { %v2109_v44 = vmax.f32 %v2077_v9, 0.0  ;;  %v1740_v50 = vadd.f32 %v1648_v38, %v1496_v53  ;;  %v643_v23 = vadd.f32 %v575_v10, %v366_v55  ;;  %v820_v58 = vsel %vm747_vm1, %v818_v32, %v819_v36 }
 0x113   : > { %v1130_v61 = vrot.slane %v1006_v42, 1  ;;  %v5475_v0 = vrot.slane %v4796_v15, 1  ;;  %v4809_v43 = vmul.f32 %v3251_v18, %v4579_v56  ;;  %v1374_v27 = vrot.slane %v1250_v52, 2 }
 0x114   : > { %2950 = vmatmul.mubr.msk.f32.gmra.mxu1 %vm2118_vm2, %v2109_v44  ;;  %v1984_v59 = vadd.f32 %v1892_v20, %v1740_v50  ;;  %v888_v55 = vadd.f32 %v820_v58, %v643_v23  ;;  %v1480_v38 = vmul.f32 %v3293_v40, %v4804_v35  ;;  %v1562_v41 = vmul.f32 %v3302_v45, %v4804_v35 }
 0x115   : > { %v1132_v62 = vsel %vm502_vm0, %v1130_v61, %v5475_v0  ;;  %v5474_v31 = vrot.slane %v4809_v43, 2  ;;  %v4825_v9 = vmul.f32 %v3302_v45, %v4813_v39  ;;  %v1806_v20 = vmul.f32 %v3316_v51, %v4804_v35 }
 0x116   : > { %v2023_v53 = vmul.f32 %v4190_v3, %v1984_v59  ;;  %v956_v32 = vadd.f32 %v924_v7, %v888_v55  ;;  %v1686_v10 = vrot.slane %v1562_v41, 1  ;;  %v4832_v42 = vmul.f32 %v3316_v51, %v4813_v39 }
 0x117   : > { %v1376_v52 = vsel %vm747_vm1, %v1374_v27, %v5474_v31  ;;  %v5476_v44 = vrot.slane %v4825_v9, 1  ;;  %v1930_v50 = vrot.slane %v1806_v20, 2  ;;  %v351_v23 = vmul.f32 %v3237_v11, %v4268_v46 }
 0x118   : > { %v2062_v58 = vadd.f32 %v4208_v48, %v2023_v53  ;;  %v1200_v61 = vadd.f32 %v1132_v62, %v956_v32  ;;  %v1931_v7 = vrot.slane %v4832_v42, 2  ;;  %v426_v59 = vmul.f32 %v3239_v12, %v4389_v14 }
 0x119   : > { %v1688_v55 = vsel %vm502_vm0, %v1686_v10, %v5476_v44  ;;  %v671_v27 = vmul.f32 %v3241_v13, %v4389_v14  ;;  %v909_v41 = vmul.f32 %v3247_v16, %v4502_v30  ;;  %v984_v46 = vmul.f32 %v3249_v17, %v4623_v57 }
 0x11a   : > { %v2094_v62 = vmax.f32 %v2062_v58, 0.0  ;;  %v1444_v20 = vadd.f32 %v1376_v52, %v1200_v61  ;;  %v1932_v53 = vsel %vm747_vm1, %v1930_v50, %v1931_v7  ;;  %v536_v32 = vrot.slane %v426_v59, 1  ;;  %v4865_v58 = vld [vmem:[%s3235_s15 + $0xd0] sm:$0x3] }
 0x11b   : > { %v781_v31 = vrot.slane %v671_v27, 2  ;;  %v1093_v0 = vrot.slane %v984_v46, 1  ;;  %v1228_v10 = vmul.f32 %v3251_v18, %v4623_v57  ;;  %v1465_v14 = vmul.f32 %v4745_v22, %v3293_v40 }
 0x11c   : > { %2928 = vmatprep.mubr.msk.f32.mxu0 %vm2118_vm2, %v2094_v62  ;;  %v1512_v44 = vadd.f32 %v1480_v38, %v1444_v20  ;;  %v537_v52 = vsel %vm502_vm0, %v534_v54, %v536_v32  ;;  %v1540_v50 = vmul.f32 %v4865_v58, %v3302_v45  ;;  %v1784_v61 = vmul.f32 %v4865_v58, %v3316_v51 }
 0x11d   : > { %v628_v59 = vadd.f32 %v537_v52, %v351_v23  ;;  %v782_v27 = vsel %vm747_vm1, %v779_v49, %v781_v31  ;;  %v1094_v5 = vsel %vm502_vm0, %v1091_v6, %v1093_v0  ;;  %v1337_v38 = vrot.slane %v1228_v10, 2 }
 0x11e   : > { %v1756_v54 = vadd.f32 %v1688_v55, %v1512_v44  ;;  %v1649_v46 = vrot.slane %v1540_v50, 1  ;;  %v1893_v62 = vrot.slane %v1784_v61, 2  ;;  %v367_v20 = vmul.f32 %v3237_v11, %v4345_v33 }
 0x11f   : > { %v873_v32 = vadd.f32 %v782_v27, %v628_v59  ;;  %v1338_v23 = vsel %vm747_vm1, %v1335_v2, %v1337_v38  ;;  %v450_v63 = vmul.f32 %v3239_v12, %v4427_v8  ;;  %v695_v49 = vmul.f32 %v3241_v13, %v4427_v8  ;;  %v4895_v2 = vld [vmem:[%s3235_s15 + $0x190] sm:$0x3] }
 0x120   : > { %v2000_v24 = vadd.f32 %v1932_v53, %v1756_v54  ;;  %v1650_v6 = vsel %vm502_vm0, %v1647_v19, %v1649_v46  ;;  %v1894_v33 = vsel %vm747_vm1, %v1891_v37, %v1893_v62  ;;  %v925_v47 = vmul.f32 %v3247_v16, %v4579_v56 }
 0x121   : > { %v941_v0 = vadd.f32 %v909_v41, %v873_v32  ;;  %v576_v31 = vrot.slane %v450_v63, 1  ;;  %v821_v44 = vrot.slane %v695_v49, 2  ;;  %v1008_v8 = vmul.f32 %v3249_v17, %v4661_v25 }
 0x122   : > { %v2039_v55 = vmul.f32 %v4190_v3, %v2000_v24  ;;  %v1252_v4 = vmul.f32 %v3251_v18, %v4661_v25  ;;  %v1481_v19 = vmul.f32 %v3293_v40, %v4813_v39  ;;  %v1564_v21 = vmul.f32 %v3302_v45, %v4895_v2 }
 0x123   : > { %v1185_v37 = vadd.f32 %v1094_v5, %v941_v0  ;;  %v577_v41 = vsel %vm502_vm0, %v574_v29, %v576_v31  ;;  %v822_v53 = vsel %vm747_vm1, %v819_v36, %v821_v44  ;;  %v1133_v10 = vrot.slane %v1008_v8, 1 }
 0x124   : > { %v2078_v3 = vadd.f32 %v4208_v48, %v2039_v55  ;;  %v644_v52 = vadd.f32 %v577_v41, %v367_v20  ;;  %v1377_v50 = vrot.slane %v1252_v4, 2  ;;  %v1689_v61 = vrot.slane %v1564_v21, 1 }
 0x125   : > { %v1429_v59 = vadd.f32 %v1338_v23, %v1185_v37  ;;  %v5499_v27 = vrot.slane %v4796_v15, 1  ;;  %v1808_v26 = vmul.f32 %v3316_v51, %v4895_v2  ;;  %v352_v29 = vmul.f32 %v3237_v11, %v4494_v60 }
 0x126   : > { %v2110_v1 = vmax.f32 %v2078_v3, 0.0  ;;  %v889_v5 = vadd.f32 %v822_v53, %v644_v52  ;;  %v5500_v36 = vrot.slane %v4809_v43, 2  ;;  %v5501_v54 = vrot.slane %v4825_v9, 1 }
 0x127   : > { %v1134_v38 = vsel %vm502_vm0, %v5499_v27, %v1133_v10  ;;  %v1497_v62 = vadd.f32 %v1465_v14, %v1429_v59  ;;  %v1933_v15 = vrot.slane %v1808_v26, 2  ;;  %v427_v20 = vmul.f32 %v3239_v12, %v4494_v60  ;;  %v4981_v27 = vld [vmem:[%s5449_s3] ss:$0 sm:$0xff] }
 0x128   : > { %v1378_v48 = vsel %vm747_vm1, %v5500_v36, %v1377_v50  ;;  %v1690_v46 = vsel %vm502_vm0, %v5501_v54, %v1689_v61  ;;  %v4930_v32 = vmul.f32 %v3239_v12, %v4502_v30  ;;  %2952 = vmatprep.mubr.msk.f32.mxu1 %vm2118_vm2, %v2110_v1  ;;  %v957_v23 = vadd.f32 %v925_v47, %v889_v5  ;;  %v4972_v50 = vld [vmem:[%s3235_s15 + $0xd8] sm:$0xff] }
 0x129   : > { %v672_v43 = vmul.f32 %v3241_v13, %v4494_v60  ;;  %v4937_v9 = vmul.f32 %v3241_v13, %v4502_v30  ;;  %v910_v14 = vmul.f32 %v4733_v28, %v3247_v16  ;;  %v1741_v63 = vadd.f32 %v1650_v6, %v1497_v62 }
 0x12a   : > { %v1934_v49 = vsel %vm747_vm1, %v1931_v7, %v1933_v15  ;;  %v538_v24 = vrot.slane %v427_v20, 1  ;;  %v539_v0 = vrot.slane %v4930_v32, 1  ;;  %v1201_v31 = vadd.f32 %v1134_v38, %v957_v23 }
 0x12b   : > { %v783_v47 = vrot.slane %v672_v43, 2  ;;  %v784_v44 = vrot.slane %v4937_v9, 2  ;;  %v985_v60 = vmul.f32 %v4733_v28, %v3249_v17  ;;  %v1985_v8 = vadd.f32 %v1894_v33, %v1741_v63  ;;  %v4963_v33 = vld [vmem:[%s5448_s2] ss:$0 sm:$0xff] }
 0x12c   : > { %v540_v6 = vsel %vm502_vm0, %v538_v24, %v539_v0  ;;  %v4953_v42 = vmul.f32 %v4745_v22, %v3249_v17  ;;  %v1229_v7 = vmul.f32 %v4733_v28, %v3251_v18  ;;  %v1445_v55 = vadd.f32 %v1378_v48, %v1201_v31 }
 0x12d   : > { %v629_v4 = vadd.f32 %v540_v6, %v352_v29  ;;  %v785_v21 = vsel %vm747_vm1, %v783_v47, %v784_v44  ;;  %v1095_v37 = vrot.slane %v985_v60, 1  ;;  %v2024_v41 = vmul.f32 %v4963_v33, %v1985_v8  ;;  %v4989_v29 = vld [vmem:[%s3235_s15 + $0xe0] sm:$0xff] }
 0x12e   : > { %v1096_v53 = vrot.slane %v4953_v42, 1  ;;  %v4969_v28 = vmul.f32 %v4745_v22, %v3251_v18  ;;  %v1339_v10 = vrot.slane %v1229_v7, 2  ;;  %v1513_v3 = vadd.f32 %v1481_v19, %v1445_v55 }
 0x12f   : > { %v874_v52 = vadd.f32 %v785_v21, %v629_v4  ;;  %v1466_v61 = vmul.f32 %v4972_v50, %v3293_v40  ;;  %v1541_v59 = vmul.f32 %v4972_v50, %v3302_v45  ;;  %v2063_v38 = vadd.f32 %v4981_v27, %v2024_v41 }
 0x130   : > { %v1097_v19 = vsel %vm502_vm0, %v1095_v37, %v1096_v53  ;;  %v1340_v26 = vrot.slane %v4969_v28, 2  ;;  %v4993_v1 = vmul.f32 %v4989_v29, %v3302_v45  ;;  %v1757_v5 = vadd.f32 %v1690_v46, %v1513_v3 }
 0x131   : > { %v942_v36 = vadd.f32 %v910_v14, %v874_v52  ;;  %v1651_v48 = vrot.slane %v1541_v59, 1  ;;  %v1785_v54 = vmul.f32 %v4972_v50, %v3316_v51  ;;  %v2095_v62 = vmax.f32 %v2063_v38, 0.0  ;;  %v328_v52 = vld [vmem:[%s3235_s15 + $0x198] sm:$0xff] }
 0x132   : > { %v1341_v15 = vsel %vm747_vm1, %v1339_v10, %v1340_v26  ;;  %v1652_v20 = vrot.slane %v4993_v1, 1  ;;  %v5003_v23 = vmul.f32 %v4989_v29, %v3316_v51  ;;  %v2001_v43 = vadd.f32 %v1934_v49, %v1757_v5 }
 0x133   : > { %v1186_v63 = vadd.f32 %v1097_v19, %v942_v36  ;;  %v1895_v24 = vrot.slane %v1785_v54, 2  ;;  %v368_v46 = vmul.f32 %v3237_v11, %v4570_v34  ;;  %2929 = vmatmul.mubr.msk.f32.gmra.mxu0 %vm2118_vm2, %v2095_v62  ;;  %v451_v47 = vmul.f32 %v3239_v12, %v4570_v34 }
 0x134   : > { %v1653_v14 = vsel %vm502_vm0, %v1651_v48, %v1652_v20  ;;  %v1896_v31 = vrot.slane %v5003_v23, 2  ;;  %v5016_v49 = vmul.f32 %v3239_v12, %v4579_v56  ;;  %v2040_v60 = vmul.f32 %v4963_v33, %v2001_v43  ;;  %v5046_v48 = vld [vmem:[%s3235_s15 + $0x1a0] sm:$0xff]  ;;  %v2912_v23 = vpop.f32.mrf.mxu0 }
 0x135   : > { %v1430_v8 = vadd.f32 %v1341_v15, %v1186_v63  ;;  %v696_v6 = vmul.f32 %v3241_v13, %v4570_v34  ;;  %v5023_v7 = vmul.f32 %v3241_v13, %v4579_v56  ;;  %v578_v4 = vrot.slane %v451_v47, 1 }
 0x136   : > { %v1897_v55 = vsel %vm747_vm1, %v1895_v24, %v1896_v31  ;;  %v579_v21 = vrot.slane %v5016_v49, 1  ;;  %v926_v37 = vmul.f32 %v3247_v16, %v4804_v35  ;;  %v2079_v41 = vadd.f32 %v4981_v27, %v2040_v60  ;;  %v5158_v49 = vld [vmem:[%s5452_s6] ss:$0 sm:$0xff] }
 0x137   : > { %v1498_v10 = vadd.f32 %v1466_v61, %v1430_v8  ;;  %v823_v3 = vrot.slane %v696_v6, 2  ;;  %v824_v34 = vrot.slane %v5023_v7, 2  ;;  %v1009_v38 = vmul.f32 %v3249_v17, %v4804_v35 }
 0x138   : > { %v580_v59 = vsel %vm502_vm0, %v578_v4, %v579_v21  ;;  %v5041_v19 = vmul.f32 %v3249_v17, %v4813_v39  ;;  %v1253_v5 = vmul.f32 %v3251_v18, %v4804_v35  ;;  %v2111_v36 = vmax.f32 %v2079_v41, 0.0 }
 0x139   : > { %v1742_v61 = vadd.f32 %v1653_v14, %v1498_v10  ;;  %v645_v54 = vadd.f32 %v580_v59, %v368_v46  ;;  %v825_v62 = vsel %vm747_vm1, %v823_v3, %v824_v34  ;;  %v1135_v15 = vrot.slane %v1009_v38, 1 }
 0x13a   : > { %v1136_v43 = vrot.slane %v5041_v19, 1  ;;  %v5054_v63 = vmul.f32 %v3251_v18, %v4813_v39  ;;  %v1379_v24 = vrot.slane %v1253_v5, 2  ;;  %2953 = vmatmul.mubr.msk.f32.gmra.mxu1 %vm2118_vm2, %v2111_v36  ;;  %v1482_v14 = vmul.f32 %v3293_v40, %v328_v52 }
 0x13b   : > { %v1986_v47 = vadd.f32 %v1897_v55, %v1742_v61  ;;  %v890_v60 = vadd.f32 %v825_v62, %v645_v54  ;;  %v1565_v46 = vmul.f32 %v3302_v45, %v328_v52  ;;  %v5065_v4 = vmul.f32 %v3302_v45, %v5046_v48 }
 0x13c   : > { %v1137_v8 = vsel %vm502_vm0, %v1135_v15, %v1136_v43  ;;  %v1380_v6 = vrot.slane %v5054_v63, 2  ;;  %v1809_v41 = vmul.f32 %v3316_v51, %v328_v52  ;;  %v5071_v59 = vmul.f32 %v3316_v51, %v5046_v48 }
 0x13d   : > { %v2025_v10 = vmul.f32 %v4963_v33, %v1986_v47  ;;  %v958_v55 = vadd.f32 %v926_v37, %v890_v60  ;;  %v1691_v3 = vrot.slane %v1565_v46, 1  ;;  %v1692_v5 = vrot.slane %v5065_v4, 1 }
 0x13e   : > { %v1381_v38 = vsel %vm747_vm1, %v1379_v24, %v1380_v6  ;;  %v1935_v36 = vrot.slane %v1809_v41, 2  ;;  %v353_v61 = vmul.f32 %v3237_v11, %v4502_v30  ;;  %v1936_v37 = vrot.slane %v5071_v59, 2 }
 0x13f   : > { %v2064_v52 = vadd.f32 %v4981_v27, %v2025_v10  ;;  %v1202_v54 = vadd.f32 %v1137_v8, %v958_v55  ;;  %v429_v62 = vmul.f32 %v3239_v12, %v4623_v57  ;;  %v1693_v15 = vsel %vm502_vm0, %v1691_v3, %v1692_v5 }
 0x140   : > { %v674_v24 = vmul.f32 %v3241_v13, %v4623_v57  ;;  %v911_v47 = vmul.f32 %v4745_v22, %v3247_v16  ;;  %v987_v30 = vmul.f32 %v4865_v58, %v3249_v17  ;;  %v1937_v8 = vsel %vm747_vm1, %v1935_v36, %v1936_v37 }
 0x141   : > { %v2096_v60 = vmax.f32 %v2064_v52, 0.0  ;;  %v1446_v46 = vadd.f32 %v1381_v38, %v1202_v54  ;;  %v541_v41 = vrot.slane %v429_v62, 1  ;;  %v1231_v3 = vmul.f32 %v4865_v58, %v3251_v18  ;;  %v5104_v52 = vld [vmem:[%s3235_s15 + $0xe8] sm:$0x3] }
 0x142   : > { %v786_v10 = vrot.slane %v674_v24, 2  ;;  %v1098_v55 = vrot.slane %v987_v30, 1  ;;  %v1467_v57 = vmul.f32 %v4989_v29, %v3293_v40  ;;  %v1543_v36 = vmul.f32 %v5104_v52, %v3302_v45 }
 0x143   : > { %2931 = vmatprep.mubr.msk.f32.mxu0 %vm2118_vm2, %v2096_v60  ;;  %v1514_v22 = vadd.f32 %v1482_v14, %v1446_v46  ;;  %v542_v38 = vsel %vm502_vm0, %v539_v0, %v541_v41  ;;  %v1787_v54 = vmul.f32 %v5104_v52, %v3316_v51  ;;  %v1342_v32 = vrot.slane %v1231_v3, 2 }
 0x144   : > { %v630_v62 = vadd.f32 %v542_v38, %v353_v61  ;;  %v787_v24 = vsel %vm747_vm1, %v784_v44, %v786_v10  ;;  %v1099_v14 = vsel %vm502_vm0, %v1096_v53, %v1098_v55  ;;  %v1654_v0 = vrot.slane %v1543_v36, 1  ;;  %v330_v38 = vld [vmem:[%s3235_s15 + $0x1a8] sm:$0x3] }
 0x145   : > { %v1758_v30 = vadd.f32 %v1693_v15, %v1514_v22  ;;  %v1898_v60 = vrot.slane %v1787_v54, 2  ;;  %v369_v46 = vmul.f32 %v3237_v11, %v4579_v56  ;;  %v1343_v61 = vsel %vm747_vm1, %v1340_v26, %v1342_v32 }
 0x146   : > { %v875_v41 = vadd.f32 %v787_v24, %v630_v62  ;;  %v453_v9 = vmul.f32 %v3239_v12, %v4661_v25  ;;  %v698_v44 = vmul.f32 %v3241_v13, %v4661_v25  ;;  %v1655_v53 = vsel %vm502_vm0, %v1652_v20, %v1654_v0  ;;  %v2281_v62 = vpop.f32.mrf.mxu0 }
 0x147   : > { %v2002_v42 = vadd.f32 %v1937_v8, %v1758_v30  ;;  %v1899_v11 = vsel %vm747_vm1, %v1896_v31, %v1898_v60  ;;  %v927_v56 = vmul.f32 %v3247_v16, %v4813_v39  ;;  %v1011_v12 = vmul.f32 %v3249_v17, %v4895_v2  ;;  %v5145_v16 = vld [vmem:[%s5451_s5] ss:$0 sm:$0xff]  ;;  %v2936_v8 = vpop.f32.mrf.mxu1 }
 0x148   : > { %v943_v28 = vadd.f32 %v911_v47, %v875_v41  ;;  %v581_v26 = vrot.slane %v453_v9, 1  ;;  %v826_v15 = vrot.slane %v698_v44, 2  ;;  %v1255_v25 = vmul.f32 %v3251_v18, %v4895_v2  ;;  %v3020_v9 = vld [vmem:[%s3235_s15 + $0x18] sm:$0xff] }
 0x149   : > { %v2041_v13 = vmul.f32 %v4963_v33, %v2002_v42  ;;  %v1483_v1 = vmul.f32 %v3293_v40, %v5046_v48  ;;  %v1567_v20 = vmul.f32 %v3302_v45, %v330_v38  ;;  %v1138_v47 = vrot.slane %v1011_v12, 1  ;;  %v2361_v32 = vpop.f32.mrf.mxu1  ;;  %v2915_v42 = vpop.f32.mrf.mxu0 }
 0x14a   : > { %v1187_v31 = vadd.f32 %v1099_v14, %v943_v28  ;;  %v582_v17 = vsel %vm502_vm0, %v579_v21, %v581_v26  ;;  %v827_v18 = vsel %vm747_vm1, %v824_v34, %v826_v15  ;;  %v1382_v48 = vrot.slane %v1255_v25, 2 }
 0x14b   : > { %v2080_v40 = vadd.f32 %v4981_v27, %v2041_v13  ;;  %v646_v45 = vadd.f32 %v582_v17, %v369_v46  ;;  %v1694_v10 = vrot.slane %v1567_v20, 1  ;;  %v1139_v7 = vsel %vm502_vm0, %v1136_v43, %v1138_v47  ;;  %v3018_v43 = vld [vmem:[%s3235_s15 + $0x20] sm:$0xff] }
 0x14c   : > { %v1431_v21 = vadd.f32 %v1343_v61, %v1187_v31  ;;  %v1811_v34 = vmul.f32 %v3316_v51, %v330_v38  ;;  %v2448_v55 = vmul.f32 %v2912_v23, %v5145_v16  ;;  %v1383_v36 = vsel %vm747_vm1, %v1380_v6, %v1382_v48  ;;  %v3019_v6 = vld [vmem:[%s3235_s15 + $0x28] sm:$0x3]  ;;  %v3021_v31 = vld [vmem:[%s3235_s15 + $0x38] sm:$0xff] }
 0x14d   : > { %v2112_v3 = vmax.f32 %v2080_v40, 0.0  ;;  %v891_v22 = vadd.f32 %v827_v18, %v646_v45  ;;  %v1695_v54 = vsel %vm502_vm0, %v1692_v5, %v1694_v10  ;;  %v2567_v14 = vrot.slane %v3018_v43, 1  ;;  %v3022_v18 = vld [vmem:[%s3235_s15 + $0x40] sm:$0x3]  ;;  %v2291_v45 = vpop.f32.mrf.mxu0 }
 0x14e   : > { %v1499_v24 = vadd.f32 %v1467_v57, %v1431_v21  ;;  %v1938_v19 = vrot.slane %v1811_v34, 2  ;;  %v2487_v51 = vadd.f32 %v5158_v49, %v2448_v55  ;;  %v2569_v30 = vrot.slane %v3019_v6, 1  ;;  %v3023_v34 = vld [vmem:[%s3235_s15 + $0xf8] sm:$0xff] }
 0x14f   : > { %2955 = vmatprep.mubr.msk.f32.mxu1 %vm2118_vm2, %v2112_v3  ;;  %v959_v63 = vadd.f32 %v927_v56, %v891_v22  ;;  %v2464_v4 = vmul.f32 %v2936_v8, %v5145_v16  ;;  %v2607_v5 = vrot.slane %v4989_v29, 1  ;;  %v2609_v60 = vrot.slane %v5104_v52, 1 }
 0x150   : > { %v1743_v57 = vadd.f32 %v1655_v53, %v1499_v24  ;;  %v1939_v0 = vsel %vm747_vm1, %v1936_v37, %v1938_v19  ;;  %v2447_v46 = vmul.f32 %v5145_v16, %v2281_v62  ;;  %v2570_v61 = vsel %vm502_vm0, %v2567_v14, %v2569_v30  ;;  %v2939_v37 = vpop.f32.mrf.mxu1  ;;  %v3024_v62 = vld [vmem:[%s3235_s15 + $0x100] sm:$0x3]  ;;  %v3027_v30 = vld [vmem:[%s3235_s15 + $0x50] sm:$0xff] }
 0x151   : > { %v1203_v41 = vadd.f32 %v1139_v7, %v959_v63  ;;  %v2503_v38 = vadd.f32 %v5158_v49, %v2464_v4  ;;  %v2566_v44 = vrot.slane %v3020_v9, 1  ;;  %v2679_v29 = vadd.f32 %v2570_v61, %v2487_v51  ;;  %v3025_v51 = vld [vmem:[%s3235_s15 + $0x30] sm:$0xff] }
 0x152   : > { %v1987_v56 = vadd.f32 %v1899_v11, %v1743_v57  ;;  %v2610_v53 = vsel %vm502_vm0, %v2607_v5, %v2609_v60  ;;  %v2486_v59 = vadd.f32 %v5158_v49, %v2447_v46  ;;  %v2463_v15 = vmul.f32 %v5145_v16, %v2361_v32  ;;  %v2371_v48 = vpop.f32.mrf.mxu1  ;;  %v3026_v63 = vld [vmem:[%s3235_s15 + $0xf0] sm:$0xff] }
 0x153   : > { %v1447_v52 = vadd.f32 %v1383_v36, %v1203_v41  ;;  %v2695_v28 = vadd.f32 %v2610_v53, %v2503_v38  ;;  %v2568_v26 = vsel %vm502_vm0, %v2566_v44, %v2567_v14  ;;  %2711 = vst.msk [vmem:[%s5195_s23 + $0x8] sm:$0xff] %vm2118_vm2, %v2679_v29  ;;  %v2606_v13 = vrot.slane %v4972_v50, 1 }
 0x154   : > { %v2026_v12 = vmul.f32 %v4963_v33, %v1987_v56  ;;  %v2678_v11 = vadd.f32 %v2568_v26, %v2486_v59  ;;  %v2450_v25 = vmul.f32 %v2915_v42, %v5145_v16  ;;  %v2502_v23 = vadd.f32 %v5158_v49, %v2463_v15  ;;  %v3029_v59 = vld [vmem:[%s3235_s15 + $0x48] sm:$0xff] }
 0x155   : > { %v1515_v20 = vadd.f32 %v1483_v1, %v1447_v52  ;;  %2727 = vst.msk [vmem:[%s5195_s23 + $0x88] sm:$0xff] %vm2118_vm2, %v2695_v28  ;;  %v2572_v17 = vrot.slane %v3021_v31, 1  ;;  %v2574_v47 = vrot.slane %v3022_v18, 1  ;;  %v2608_v40 = vsel %vm502_vm0, %v2606_v13, %v2607_v5  ;;  %v3028_v5 = vld [vmem:[%s3235_s15 + $0x58] sm:$0x3] }
 0x156   : > { %v2065_v8 = vadd.f32 %v4981_v27, %v2026_v12  ;;  %2710 = vst.msk [vmem:[%s5195_s23] sm:$0xff] %vm2118_vm2, %v2678_v11  ;;  %v2489_v50 = vadd.f32 %v5158_v49, %v2450_v25  ;;  %v2466_v1 = vmul.f32 %v2939_v37, %v5145_v16  ;;  %v2694_v21 = vadd.f32 %v2608_v40, %v2502_v23  ;;  %v3030_v12 = vld [vmem:[%s3235_s15 + $0x110] sm:$0xff]  ;;  %v3031_v13 = vld [vmem:[%s3235_s15 + $0x118] sm:$0x3] }
 0x157   : > { %v1759_v10 = vadd.f32 %v1695_v54, %v1515_v20  ;;  %v2575_v7 = vsel %vm502_vm0, %v2572_v17, %v2574_v47  ;;  %v2612_v55 = vrot.slane %v3023_v34, 1  ;;  %v2614_v24 = vrot.slane %v3024_v62, 1 }
 0x158   : > { %v2097_v3 = vmax.f32 %v2065_v8, 0.0  ;;  %v2681_v22 = vadd.f32 %v2575_v7, %v2489_v50  ;;  %v2505_v36 = vadd.f32 %v5158_v49, %v2466_v1  ;;  %2726 = vst.msk [vmem:[%s5195_s23 + $0x80] sm:$0xff] %vm2118_vm2, %v2694_v21  ;;  %v2449_v54 = vmul.f32 %v5145_v16, %v2291_v45  ;;  %v2918_v9 = vpop.f32.mrf.mxu0  ;;  %v3033_v7 = vld [vmem:[%s3235_s15 + $0x68] sm:$0xff] }
 0x159   : > { %v2003_v19 = vadd.f32 %v1939_v0, %v1759_v10  ;;  %v2571_v43 = vrot.slane %v3025_v51, 1  ;;  %v2465_v14 = vmul.f32 %v5145_v16, %v2371_v48  ;;  %v2615_v32 = vsel %vm502_vm0, %v2612_v55, %v2614_v24 }
 0x15a   : > { %2932 = vmatmul.mubr.msk.f32.gmra.mxu0 %vm2118_vm2, %v2097_v3  ;;  %2713 = vst.msk [vmem:[%s5195_s23 + $0x18] sm:$0xff] %vm2118_vm2, %v2681_v22  ;;  %v2611_v6 = vrot.slane %v3026_v63, 1  ;;  %v2577_v4 = vrot.slane %v3027_v30, 1  ;;  %v2579_v57 = vrot.slane %v3028_v5, 1  ;;  %v2697_v60 = vadd.f32 %v2615_v32, %v2505_v36  ;;  %v2301_v53 = vpop.f32.mrf.mxu0  ;;  %v3035_v36 = vld [vmem:[%s3235_s15 + $0x60] sm:$0xff]  ;;  %v3036_v63 = vld [vmem:[%s3235_s15 + $0x128] sm:$0xff] }
 0x15b   : > { %v2042_v0 = vmul.f32 %v4963_v33, %v2003_v19  ;;  %v2488_v46 = vadd.f32 %v5158_v49, %v2449_v54  ;;  %v2573_v41 = vsel %vm502_vm0, %v2571_v43, %v2572_v17  ;;  %v2504_v61 = vadd.f32 %v5158_v49, %v2465_v14  ;;  %v3032_v17 = vld [vmem:[%s3235_s15 + $0x108] sm:$0xff]  ;;  %v3037_v30 = vld [vmem:[%s3235_s15 + $0x130] sm:$0x3] }
 0x15c   : > { %v2613_v38 = vsel %vm502_vm0, %v2611_v6, %v2612_v55  ;;  %2729 = vst.msk [vmem:[%s5195_s23 + $0x98] sm:$0xff] %vm2118_vm2, %v2697_v60  ;;  %v2452_v33 = vmul.f32 %v2918_v9, %v5145_v16  ;;  %v2580_v29 = vsel %vm502_vm0, %v2577_v4, %v2579_v57  ;;  %v2576_v37 = vrot.slane %v3029_v59, 1  ;;  %v3034_v55 = vld [vmem:[%s3235_s15 + $0x70] sm:$0x3]  ;;  %v3038_v60 = vld [vmem:[%s3235_s15 + $0x120] sm:$0xff] }
 0x15d   : > { %v2081_v44 = vadd.f32 %v4981_v27, %v2042_v0  ;;  %v2680_v42 = vadd.f32 %v2573_v41, %v2488_v46  ;;  %v2696_v56 = vadd.f32 %v2613_v38, %v2504_v61  ;;  %v2451_v28 = vmul.f32 %v5145_v16, %v2301_v53  ;;  %v3039_v53 = vld [vmem:[%s3235_s15 + $0x80] sm:$0xff] }
 0x15e   : > { %v2491_v27 = vadd.f32 %v5158_v49, %v2452_v33  ;;  %v2578_v26 = vsel %vm502_vm0, %v2576_v37, %v2577_v4  ;;  %v2617_v11 = vrot.slane %v3030_v12, 1  ;;  %v2619_v25 = vrot.slane %v3031_v13, 1  ;;  %v3040_v37 = vld [vmem:[%s3235_s15 + $0x88] sm:$0x3] }
 0x15f   : > { %v2113_v52 = vmax.f32 %v2081_v44, 0.0  ;;  %2712 = vst.msk [vmem:[%s5195_s23 + $0x10] sm:$0xff] %vm2118_vm2, %v2680_v42  ;;  %2728 = vst.msk [vmem:[%s5195_s23 + $0x90] sm:$0xff] %vm2118_vm2, %v2696_v56  ;;  %v2490_v20 = vadd.f32 %v5158_v49, %v2451_v28  ;;  %v2942_v23 = vpop.f32.mrf.mxu1  ;;  %v2616_v18 = vrot.slane %v3032_v17, 1  ;;  %v2582_v34 = vrot.slane %v3033_v7, 1  ;;  %v3041_v28 = vld [vmem:[%s3235_s15 + $0x78] sm:$0xff] }
 0x160   : > { %v2683_v15 = vadd.f32 %v2580_v29, %v2491_v27  ;;  %v2468_v47 = vmul.f32 %v2942_v23, %v5145_v16  ;;  %v2620_v8 = vsel %vm502_vm0, %v2617_v11, %v2619_v25  ;;  %v2584_v3 = vrot.slane %v3034_v55, 1 }
 0x161   : > { %2956 = vmatmul.mubr.msk.f32.gmra.mxu1 %vm2118_vm2, %v2113_v52  ;;  %v2682_v31 = vadd.f32 %v2578_v26, %v2490_v20  ;;  %v2381_v40 = vpop.f32.mrf.mxu1  ;;  %v2618_v45 = vsel %vm502_vm0, %v2616_v18, %v2617_v11  ;;  %v2581_v62 = vrot.slane %v3035_v36, 1  ;;  %v2622_v6 = vrot.slane %v3036_v63, 1  ;;  %v3043_v18 = vld [vmem:[%s3235_s15 + $0x148] sm:$0x3] }
 0x162   : > { %2715 = vst.msk [vmem:[%s5195_s23 + $0x28] sm:$0xff] %vm2118_vm2, %v2683_v15  ;;  %v2507_v50 = vadd.f32 %v5158_v49, %v2468_v47  ;;  %v2467_v1 = vmul.f32 %v5145_v16, %v2381_v40  ;;  %v2585_v19 = vsel %vm502_vm0, %v2582_v34, %v2584_v3  ;;  %v2624_v4 = vrot.slane %v3037_v30, 1 }
 0x163   : > { %2714 = vst.msk [vmem:[%s5195_s23 + $0x20] sm:$0xff] %vm2118_vm2, %v2682_v31  ;;  %v2583_v14 = vsel %vm502_vm0, %v2581_v62, %v2582_v34  ;;  %v2621_v46 = vrot.slane %v3038_v60, 1  ;;  %v2587_v59 = vrot.slane %v3039_v53, 1  ;;  %v2589_v52 = vrot.slane %v3040_v37, 1  ;;  %v3042_v31 = vld [vmem:[%s3235_s15 + $0x140] sm:$0xff]  ;;  %v3045_v62 = vld [vmem:[%s3235_s15 + $0x98] sm:$0xff] }
 0x164   : > { %v2699_v48 = vadd.f32 %v2620_v8, %v2507_v50  ;;  %v2506_v10 = vadd.f32 %v5158_v49, %v2467_v1  ;;  %v2625_v61 = vsel %vm502_vm0, %v2622_v6, %v2624_v4  ;;  %v2586_v26 = vrot.slane %v3041_v28, 1  ;;  %v3044_v1 = vld [vmem:[%s3235_s15 + $0x138] sm:$0xff] }
 0x165   : > { %v2623_v42 = vsel %vm502_vm0, %v2621_v46, %v2622_v6  ;;  %v2590_v12 = vsel %vm502_vm0, %v2587_v59, %v2589_v52  ;;  %v2627_v17 = vrot.slane %v3042_v31, 1  ;;  %v2629_v47 = vrot.slane %v3043_v18, 1  ;;  %v3049_v46 = vld [vmem:[%s3235_s15 + $0x160] sm:$0x3] }
 0x166   : > { %2731 = vst.msk [vmem:[%s5195_s23 + $0xa8] sm:$0xff] %vm2118_vm2, %v2699_v48  ;;  %v2698_v21 = vadd.f32 %v2618_v45, %v2506_v10  ;;  %v2588_v20 = vsel %vm502_vm0, %v2586_v26, %v2587_v59  ;;  %v2626_v45 = vrot.slane %v3044_v1, 1  ;;  %v3051_v26 = vld [vmem:[%s3235_s15 + $0xb0] sm:$0xff] }
 0x167   : > { %v2630_v10 = vsel %vm502_vm0, %v2627_v17, %v2629_v47 }
 0x168   : > { %2730 = vst.msk [vmem:[%s5195_s23 + $0xa0] sm:$0xff] %vm2118_vm2, %v2698_v21  ;;  %v2628_v55 = vsel %vm502_vm0, %v2626_v45, %v2627_v17  ;;  %v3055_v45 = vld [vmem:[%s3235_s15 + $0x178] sm:$0x3] }
 0x17f   : > { %v2921_v22 = vpop.f32.mrf.mxu0 }
 0x180   : > { %v2454_v24 = vmul.f32 %v2921_v22, %v5145_v16 }
 0x181   : > { %v2311_v54 = vpop.f32.mrf.mxu0 }
 0x182   : > { %v2493_v51 = vadd.f32 %v5158_v49, %v2454_v24  ;;  %v2453_v43 = vmul.f32 %v5145_v16, %v2311_v54  ;;  %v2592_v24 = vrot.slane %v3045_v62, 1 }
 0x184   : > { %v2685_v32 = vadd.f32 %v2585_v19, %v2493_v51  ;;  %v2492_v5 = vadd.f32 %v5158_v49, %v2453_v43  ;;  %v3046_v19 = vld [vmem:[%s3235_s15 + $0xa0] sm:$0x3]  ;;  %v3047_v43 = vld [vmem:[%s3235_s15 + $0x90] sm:$0xff] }
 0x185   : > { %v2594_v54 = vrot.slane %v3046_v19, 1 }
 0x186   : > { %2717 = vst.msk [vmem:[%s5195_s23 + $0x38] sm:$0xff] %vm2118_vm2, %v2685_v32  ;;  %v2945_v57 = vpop.f32.mrf.mxu1  ;;  %v2684_v0 = vadd.f32 %v2583_v14, %v2492_v5  ;;  %v2591_v14 = vrot.slane %v3047_v43, 1 }
 0x187   : > { %v2470_v41 = vmul.f32 %v2945_v57, %v5145_v16  ;;  %v2595_v63 = vsel %vm502_vm0, %v2592_v24, %v2594_v54 }
 0x188   : > { %2716 = vst.msk [vmem:[%s5195_s23 + $0x30] sm:$0xff] %vm2118_vm2, %v2684_v0  ;;  %v2391_v38 = vpop.f32.mrf.mxu1  ;;  %v2593_v5 = vsel %vm502_vm0, %v2591_v14, %v2592_v24  ;;  %v3048_v0 = vld [vmem:[%s3235_s15 + $0x158] sm:$0xff]  ;;  %v3057_v14 = vld [vmem:[%s3235_s15 + $0xc8] sm:$0xff] }
 0x189   : > { %v2509_v9 = vadd.f32 %v5158_v49, %v2470_v41  ;;  %v2469_v44 = vmul.f32 %v5145_v16, %v2391_v38  ;;  %v2632_v60 = vrot.slane %v3048_v0, 1  ;;  %v2634_v41 = vrot.slane %v3049_v46, 1 }
 0x18b   : > { %v2701_v33 = vadd.f32 %v2625_v61, %v2509_v9  ;;  %v2508_v56 = vadd.f32 %v5158_v49, %v2469_v44  ;;  %v3050_v44 = vld [vmem:[%s3235_s15 + $0x150] sm:$0xff] }
 0x18d   : > { %2733 = vst.msk [vmem:[%s5195_s23 + $0xb8] sm:$0xff] %vm2118_vm2, %v2701_v33  ;;  %v2700_v29 = vadd.f32 %v2623_v42, %v2508_v56  ;;  %v2631_v42 = vrot.slane %v3050_v44, 1  ;;  %v2635_v56 = vsel %vm502_vm0, %v2632_v60, %v2634_v41 }
 0x18f   : > { %2732 = vst.msk [vmem:[%s5195_s23 + $0xb0] sm:$0xff] %vm2118_vm2, %v2700_v29  ;;  %v2633_v37 = vsel %vm502_vm0, %v2631_v42, %v2632_v60 }
 0x1a6   : > { %v2924_v27 = vpop.f32.mrf.mxu0 }
 0x1a7   : > { %v2456_v15 = vmul.f32 %v2924_v27, %v5145_v16 }
 0x1a8   : > { %v2321_v11 = vpop.f32.mrf.mxu0 }
 0x1a9   : > { %v2495_v13 = vadd.f32 %v5158_v49, %v2456_v15  ;;  %v2455_v25 = vmul.f32 %v5145_v16, %v2321_v11  ;;  %v2597_v15 = vrot.slane %v3051_v26, 1 }
 0x1ab   : > { %v2687_v23 = vadd.f32 %v2590_v12, %v2495_v13  ;;  %v2494_v8 = vadd.f32 %v5158_v49, %v2455_v25  ;;  %v3052_v12 = vld [vmem:[%s3235_s15 + $0xb8] sm:$0x3]  ;;  %v3053_v25 = vld [vmem:[%s3235_s15 + $0xa8] sm:$0xff] }
 0x1ac   : > { %v2599_v11 = vrot.slane %v3052_v12, 1 }
 0x1ad   : > { %2719 = vst.msk [vmem:[%s5195_s23 + $0x48] sm:$0xff] %vm2118_vm2, %v2687_v23  ;;  %v2948_v40 = vpop.f32.mrf.mxu1  ;;  %v2686_v50 = vadd.f32 %v2588_v20, %v2494_v8  ;;  %v2596_v20 = vrot.slane %v3053_v25, 1 }
 0x1ae   : > { %v2472_v48 = vmul.f32 %v2948_v40, %v5145_v16  ;;  %v2600_v31 = vsel %vm502_vm0, %v2597_v15, %v2599_v11 }
 0x1af   : > { %2718 = vst.msk [vmem:[%s5195_s23 + $0x40] sm:$0xff] %vm2118_vm2, %v2686_v50  ;;  %v2401_v21 = vpop.f32.mrf.mxu1  ;;  %v2598_v8 = vsel %vm502_vm0, %v2596_v20, %v2597_v15  ;;  %v3054_v50 = vld [vmem:[%s3235_s15 + $0x170] sm:$0xff] }
 0x1b0   : > { %v2511_v7 = vadd.f32 %v5158_v49, %v2472_v48  ;;  %v2471_v34 = vmul.f32 %v5145_v16, %v2401_v21  ;;  %v2637_v1 = vrot.slane %v3054_v50, 1  ;;  %v2639_v48 = vrot.slane %v3055_v45, 1 }
 0x1b2   : > { %v2703_v3 = vadd.f32 %v2630_v10, %v2511_v7  ;;  %v2510_v22 = vadd.f32 %v5158_v49, %v2471_v34  ;;  %v3056_v34 = vld [vmem:[%s3235_s15 + $0x168] sm:$0xff] }
 0x1b4   : > { %2735 = vst.msk [vmem:[%s5195_s23 + $0xc8] sm:$0xff] %vm2118_vm2, %v2703_v3  ;;  %v2702_v36 = vadd.f32 %v2628_v55, %v2510_v22  ;;  %v2636_v55 = vrot.slane %v3056_v34, 1  ;;  %v2640_v22 = vsel %vm502_vm0, %v2637_v1, %v2639_v48 }
 0x1b6   : > { %2734 = vst.msk [vmem:[%s5195_s23 + $0xc0] sm:$0xff] %vm2118_vm2, %v2702_v36  ;;  %v2638_v19 = vsel %vm502_vm0, %v2636_v55, %v2637_v1 }
 0x1cd   : > { %v2927_v51 = vpop.f32.mrf.mxu0 }
 0x1ce   : > { %v2458_v32 = vmul.f32 %v2927_v51, %v5145_v16 }
 0x1cf   : > { %v2331_v6 = vpop.f32.mrf.mxu0 }
 0x1d0   : > { %v2497_v30 = vadd.f32 %v5158_v49, %v2458_v32  ;;  %v2457_v4 = vmul.f32 %v5145_v16, %v2331_v6  ;;  %v2602_v32 = vrot.slane %v3057_v14, 1 }
 0x1d2   : > { %v2689_v57 = vadd.f32 %v2595_v63, %v2497_v30  ;;  %v2496_v61 = vadd.f32 %v5158_v49, %v2457_v4  ;;  %v2604_v63 = vrot.slane %v4865_v58, 1  ;;  %v3058_v30 = vld [vmem:[%s3235_s15 + $0xc0] sm:$0xff]  ;;  %v2642_v58 = vrot.slane %v4813_v39, 1  ;;  %s2865_s15 = sshll.u32 %s3185_s28, 12  ;;  %s5406_s28 = scalar_lea.sflag [#allocation3], %s269_s19 }
 0x1d3   : > { %v2601_v4 = vrot.slane %v3058_v30, 1  ;;  %s5396_s13 = scalar_lea.hbm %s5453_s7, %s2865_s15 }
 0x1d4   : > { %2721 = vst.msk [vmem:[%s5195_s23 + $0x58] sm:$0xff] %vm2118_vm2, %v2689_v57  ;;  %v2951_v38 = vpop.f32.mrf.mxu1  ;;  %v2688_v9 = vadd.f32 %v2593_v5, %v2496_v61  ;;  %v2605_v57 = vsel %vm502_vm0, %v2602_v32, %v2604_v63 }
 0x1d5   : > { %v2474_v33 = vmul.f32 %v2951_v38, %v5145_v16  ;;  %v2603_v41 = vsel %vm502_vm0, %v2601_v4, %v2602_v32  ;;  %v2644_v38 = vrot.slane %v4895_v2, 1 }
 0x1d6   : > { %2720 = vst.msk [vmem:[%s5195_s23 + $0x50] sm:$0xff] %vm2118_vm2, %v2688_v9  ;;  %v2411_v29 = vpop.f32.mrf.mxu1 }
 0x1d7   : > { %v2513_v53 = vadd.f32 %v5158_v49, %v2474_v33  ;;  %v2473_v59 = vmul.f32 %v5145_v16, %v2411_v29  ;;  %v2641_v33 = vrot.slane %v4804_v35, 1  ;;  %v2645_v29 = vsel %vm502_vm0, %v2642_v58, %v2644_v38 }
 0x1d9   : > { %v2705_v52 = vadd.f32 %v2635_v56, %v2513_v53  ;;  %v2512_v27 = vadd.f32 %v5158_v49, %v2473_v59  ;;  %v2643_v59 = vsel %vm502_vm0, %v2641_v33, %v2642_v58 }
 0x1db   : > { %2737 = vst.msk [vmem:[%s5195_s23 + $0xd8] sm:$0xff] %vm2118_vm2, %v2705_v52  ;;  %v2704_v28 = vadd.f32 %v2633_v37, %v2512_v27 }
 0x1dd   : > { %2736 = vst.msk [vmem:[%s5195_s23 + $0xd0] sm:$0xff] %vm2118_vm2, %v2704_v28 }
 0x1f3   : > { %v2930_v13 = vpop.f32.mrf.mxu0 }
 0x1f4   : > { %v2460_v23 = vmul.f32 %v2930_v13, %v5145_v16 }
 0x1f5   : > { %v2341_v17 = vpop.f32.mrf.mxu0 }
 0x1f6   : > { %v2499_v18 = vadd.f32 %v5158_v49, %v2460_v23  ;;  %v2459_v47 = vmul.f32 %v5145_v16, %v2341_v17 }
 0x1f8   : > { %v2691_v40 = vadd.f32 %v2600_v31, %v2499_v18  ;;  %v2498_v10 = vadd.f32 %v5158_v49, %v2459_v47 }
 0x1fa   : > { %2723 = vst.msk [vmem:[%s5195_s23 + $0x68] sm:$0xff] %vm2118_vm2, %v2691_v40  ;;  %v2954_v21 = vpop.f32.mrf.mxu1  ;;  %v2690_v7 = vadd.f32 %v2598_v8, %v2498_v10 }
 0x1fb   : > { %v2476_v3 = vmul.f32 %v2954_v21, %v5145_v16 }
 0x1fc   : > { %2722 = vst.msk [vmem:[%s5195_s23 + $0x60] sm:$0xff] %vm2118_vm2, %v2690_v7  ;;  %v2421_v36 = vpop.f32.mrf.mxu1 }
 0x1fd   : > { %v2515_v62 = vadd.f32 %v5158_v49, %v2476_v3  ;;  %v2475_v24 = vmul.f32 %v5145_v16, %v2421_v36 }
 0x1ff   : > { %v2707_v54 = vadd.f32 %v2640_v22, %v2515_v62  ;;  %v2514_v51 = vadd.f32 %v5158_v49, %v2475_v24 }
 0x201   : > { %2739 = vst.msk [vmem:[%s5195_s23 + $0xe8] sm:$0xff] %vm2118_vm2, %v2707_v54  ;;  %v2706_v43 = vadd.f32 %v2638_v19, %v2514_v51 }
 0x203   : > { %2738 = vst.msk [vmem:[%s5195_s23 + $0xe0] sm:$0xff] %vm2118_vm2, %v2706_v43 }
 0x21a   : > { %v2933_v6 = vpop.f32.mrf.mxu0 }
 0x21b   : > { %v2462_v5 = vmul.f32 %v2933_v6, %v5145_v16 }
 0x21c   : > { %v2351_v0 = vpop.f32.mrf.mxu0 }
 0x21d   : > { %v2501_v60 = vadd.f32 %v5158_v49, %v2462_v5  ;;  %v2461_v46 = vmul.f32 %v5145_v16, %v2351_v0 }
 0x21f   : > { %v2693_v61 = vadd.f32 %v2605_v57, %v2501_v60  ;;  %v2500_v9 = vadd.f32 %v5158_v49, %v2461_v46 }
 0x221   : > { %2725 = vst.msk [vmem:[%s5195_s23 + $0x78] sm:$0xff] %vm2118_vm2, %v2693_v61  ;;  %v2957_v44 = vpop.f32.mrf.mxu1  ;;  %v2692_v42 = vadd.f32 %v2603_v41, %v2500_v9 }
 0x222   : > { %v2478_v56 = vmul.f32 %v2957_v44, %v5145_v16 }
 0x223   : > { %2724 = vst.msk [vmem:[%s5195_s23 + $0x70] sm:$0xff] %vm2118_vm2, %v2692_v42  ;;  %v2431_v39 = vpop.f32.mrf.mxu1 }
 0x224   : > { %v2517_v2 = vadd.f32 %v5158_v49, %v2478_v56  ;;  %v2477_v53 = vmul.f32 %v5145_v16, %v2431_v39 }
 0x226   : > { %v2709_v37 = vadd.f32 %v2645_v29, %v2517_v2  ;;  %v2516_v35 = vadd.f32 %v5158_v49, %v2477_v53 }
 0x228   : > { %2741 = vst.msk [vmem:[%s5195_s23 + $0xf8] sm:$0xff] %vm2118_vm2, %v2709_v37  ;;  %v2708_v16 = vadd.f32 %v2643_v59, %v2516_v35 }
 0x22a   : > { %2740 = vst.msk [vmem:[%s5195_s23 + $0xf0] sm:$0xff] %vm2118_vm2, %v2708_v16 }
 0x22b   : > { %3072 = shalt.err (!%p3069_p3)
}
 0x22c   : > { %s3073_s19 = scalar_lea.hbm %s5396_s13, 4096  ;;  %s3077_s22 = scalar_lea.hbm %s5453_s7, 8192 }
 0x22d   : > { %p3074_p4 = scmp.ne.s32.totalorder %s5396_s13, %s3073_s19  ;;  %p3078_p9 = scmp.lt.s32.totalorder %s5396_s13, %s5453_s7 }
 0x22e   : > { %p3079_p10 = scmp.lt.s32.totalorder %s3077_s22, %s3073_s19 }
 0x22f   : > { %p3075_p7 = pnand %p3074_p4, %p3202_p5 }
 0x230   : > { %p3080_p11 = por %p3079_p10, %p3078_p9 }
 0x231   : > { %p3076_p8 = pneg %p3075_p7 }
 0x233   : > { %p3081_p12 = pnand %p3080_p11, %p3076_p8 }
 0x235   : > { %3084 = shalt.err (!%p3081_p12)
}
 0x236   : > { %s3122_s8 = smov 128   ;;  %s3123_s9 = smov 8  }
 0x237   : > { %2967 = dma.vmem_to_hbm [thread:$0]  (%p3202_p5), %s5398_s29, 4096, %s5396_s13, %s5406_s28, %s3122_s8, %s3122_s8, %s3123_s9  }
 0x238 PF: > { %p2973_p13 = scmp.ge.s32.totalorder %s3119_s27, 2  ;;  %s2771_s14 = sand.u32 1, %s3107_s24  }
 0x239   : > { %s2772_s16 = scalar_lea.sflag [#allocation3], %s2771_s14 }
 0x23a   : > { %p2970_p0 = pnand %p2973_p13, %p3206_p6 }
 0x23c   : > { %p2971_p1 = pneg %p2970_p0 }
 0x23e   : > { %3102 = dma.done.wait (%p2971_p1), %s2772_s16, 4096  }
 0x23f   : > { %3104 = vsyncadd (%p2971_p1), %s2772_s16, 4294963200  ;;  %p17_p2 = scmp.ge.s32.totalorder %s3189_s30, 4   ;;  %s5502_s24 = smov %s3111_s25 }
 0x240   : > { %s5503_s25 = smov %s3115_s26  ;;  %s5504_s26 = smov %s3200_s10 }
 0x241   : > { %s5505_s27 = smov %s3189_s30  ;;  %19 = sbr.rel (!%p17_p2) target bundleno = 3 (0x3), region = 83 }
 0x246   :  { %2777 = vsyncpa [#allocation3], 1 }
 0x247   :  { %2779 = vsyncpa [#allocation3 + $0x1], 1 }

</bundles_post_ra>
